<compile_context>
chip_gen: v6e
topology: v6e:2x2x1
jax: 0.10.0
libtpu: 0.0.40
codegen_flags: <defaults>
</compile_context>

<pallas_src>
import functools

import jax
import jax.numpy as jnp
from jax.experimental import pallas as pl
from jax.experimental.pallas import tpu as pltpu


def lstm_chunk_kernel(emb_ref, wih_ref, whh_ref, b_ref, wout_ref, bout_ref,
                      last_ref, h_out_ref, c_out_ref,
                      gates_sc, h_sc, c_sc, *, seq_len, chunk):
    """One (batch-tile, time-chunk) step of the LSTM recurrence + linear head.

    emb_ref  : (Tc, Bt, E) bf16  time-major embedded chunk for this batch tile
    wih_ref  : (E, 4H)     bf16  input->gates weights  (gate order [i,f,o,g])
    whh_ref  : (H, 4H)     bf16  hidden->gates weights (gate order [i,f,o,g])
    b_ref    : (1, 4H)     f32   b_ih + b_hh           (gate order [i,f,o,g])
    wout_ref : (H, 128)    f32   output_layer.weight^T, lane-padded (col 0 real)
    bout_ref : (1, 128)    f32   output_layer.bias, lane-padded (col 0 real)
    last_ref : (Bt, 128)   f32   lane-padded head output (col 0 = final[:, -1, 0])
    h_out_ref: (Bt, H)     f32   final hidden state
    c_out_ref: (Bt, H)     f32   final cell state
    gates_sc : (Tc*Bt, 4H) f32   VMEM-staged input-projection gates
    h_sc,c_sc: (Bt, H)     f32   VMEM scratch carrying the recurrent state
    """
    Bt, H = h_sc.shape
    t_blk = pl.program_id(1)

    @pl.when(t_blk == 0)
    def _init():
        h_sc[...] = jnp.zeros_like(h_sc)
        c_sc[...] = jnp.zeros_like(c_sc)

    # Hoisted input projection: one MXU GEMM (+ bias) for the whole chunk,
    # staged into VMEM scratch so the serial loop only loads small per-step
    # slices instead of keeping (Tc*Bt, 4H) f32 live in vregs.
    emb2d = emb_ref[...].reshape(chunk * Bt, -1)                 # (Tc*Bt, E)
    gates_sc[...] = (jnp.dot(emb2d, wih_ref[...],
                             preferred_element_type=jnp.float32)
                     + b_ref[...])                               # (Tc*Bt, 4H) f32

    whh = whh_ref[...]                                           # hoisted weight read
    t0 = t_blk * chunk
    ragged = (seq_len % chunk) != 0                              # static

    # TODO(synk): keep W_hh staged in the MXU weight registers across the
    # unrolled steps (pltpu.matmul_push_rhs / matmul_acc_lhs / matmul_pop) if
    # the bundle dump shows a per-step weight push.
    def step(t, carry):
        h, c = carry
        row = pl.multiple_of(t * Bt, Bt)
        gates = gates_sc[pl.ds(row, Bt), :] + jnp.dot(
            h.astype(whh.dtype), whh, preferred_element_type=jnp.float32)
        # Gate columns were permuted to [i, f, o, g] in the wrapper:
        # one sigmoid over 3H lanes, one tanh over H lanes.
        acts = jax.nn.sigmoid(gates[:, :3 * H])
        i_g = acts[:, 0 * H:1 * H]
        f_g = acts[:, 1 * H:2 * H]
        o_g = acts[:, 2 * H:3 * H]
        g_g = jnp.tanh(gates[:, 3 * H:])
        c_new = f_g * c + i_g * g_g
        h_new = o_g * jnp.tanh(c_new)
        if ragged:
            # Mask padded timesteps in the (only) ragged final chunk.
            step_idx = jnp.full((Bt, H), t0 + t, dtype=jnp.int32)
            keep = step_idx < seq_len
            h_new = jnp.where(keep, h_new, h)
            c_new = jnp.where(keep, c_new, c)
        return h_new, c_new

    h, c = jax.lax.fori_loop(0, chunk, step, (h_sc[...], c_sc[...]),
                             unroll=True)
    h_sc[...] = h
    c_sc[...] = c

    @pl.when(t_blk == pl.num_programs(1) - 1)
    def _finalize():
        h_out_ref[...] = h
        c_out_ref[...] = c
        # final_output[:, -1, 0] depends only on the last hidden state.
        last_ref[...] = (jnp.dot(h, wout_ref[...],
                                 preferred_element_type=jnp.float32)
                         + bout_ref[...])


def _round_up(x, m):
    return (x + m - 1) // m * m


def _permute_ifog(w, H):
    """Reorder PyTorch LSTM gate columns [i, f, g, o] -> [i, f, o, g]."""
    return jnp.concatenate(
        [w[..., 0:2 * H], w[..., 3 * H:4 * H], w[..., 2 * H:3 * H]], axis=-1)


def model_forward(X, params, max_chunk=64):
    """X: (B, T) int32 token ids. Returns (final (B,), hidden (1,B,H), cell (1,B,H))."""
    emb_table = params["embedding"]                 # (V, E)
    E = emb_table.shape[1]
    H = params["w_hh"].shape[0]
    B, T = X.shape

    # Batch: pad to a multiple of 8 (full sublanes / unmasked stores); tile so
    # the leading 'parallel' grid axis can shard batch tiles across TensorCores
    # (v7x has two; neutral on v5e/v6e and for a single tile).
    Bt = min(_round_up(B, 8), 64)
    B_pad = _round_up(B, Bt)
    n_btiles = B_pad // Bt

    # Time: stream the sequence in Tc-step chunks; ragged tail is masked in-kernel.
    Tc = min(max_chunk, T)
    T_pad = _round_up(T, Tc)
    n_chunks = T_pad // Tc

    # TODO(synk): move the embedding gather into the kernel (scalar-prefetched
    # token ids + VMEM-resident bf16 table or per-row DMA gather) to drop the
    # remaining (T, B, E) HBM materialization.
    X_pad = jnp.zeros((B_pad, T_pad), jnp.int32).at[:B, :T].set(X)
    emb_tm = jnp.take(emb_table.astype(jnp.bfloat16), X_pad.T, axis=0)  # (T_pad, B_pad, E)

    # Weights: bf16 MXU operands, gate columns permuted to [i, f, o, g].
    w_ih = _permute_ifog(params["w_ih"], H).astype(jnp.bfloat16)        # (E, 4H)
    w_hh = _permute_ifog(params["w_hh"], H).astype(jnp.bfloat16)        # (H, 4H)
    b_gates = _permute_ifog(params["b_gates"], H)                       # (1, 4H) f32
    # Lane-dense head: pad (H, 1) / (1, 1) to 128 lanes (column 0 is real).
    w_out_p = jnp.zeros((H, 128), jnp.float32).at[:, 0:1].set(params["w_out"])
    b_out_p = jnp.zeros((1, 128), jnp.float32).at[:, 0:1].set(params["b_out"])

    grid_spec = pltpu.PrefetchScalarGridSpec(
        num_scalar_prefetch=0,
        grid=(n_btiles, n_chunks),
        in_specs=[
            pl.BlockSpec((Tc, Bt, E), lambda b, t: (t, b, 0)),   # streamed chunk
            pl.BlockSpec((E, 4 * H), lambda b, t: (0, 0)),       # resident weights
            pl.BlockSpec((H, 4 * H), lambda b, t: (0, 0)),
            pl.BlockSpec((1, 4 * H), lambda b, t: (0, 0)),
            pl.BlockSpec((H, 128), lambda b, t: (0, 0)),
            pl.BlockSpec((1, 128), lambda b, t: (0, 0)),
        ],
        out_specs=[
            pl.BlockSpec((Bt, 128), lambda b, t: (b, 0)),        # lane-dense head
            pl.BlockSpec((Bt, H), lambda b, t: (b, 0)),          # h_T
            pl.BlockSpec((Bt, H), lambda b, t: (b, 0)),          # c_T
        ],
        scratch_shapes=[
            pltpu.VMEM((Tc * Bt, 4 * H), jnp.float32),           # staged input gates
            pltpu.VMEM((Bt, H), jnp.float32),                    # h carry
            pltpu.VMEM((Bt, H), jnp.float32),                    # c carry
        ],
    )

    out_shapes = (
        jax.ShapeDtypeStruct((B_pad, 128), jnp.float32),
        jax.ShapeDtypeStruct((B_pad, H), jnp.float32),
        jax.ShapeDtypeStruct((B_pad, H), jnp.float32),
    )

    # Actual VMEM footprint (double-buffered blocks + scratch) with 2x headroom.
    vmem_bytes = (
        2 * Tc * Bt * E * 2                                          # emb chunk (bf16) x2
        + 2 * ((E + H) * 4 * H * 2 + 4 * H * 4 + (H + 1) * 128 * 4)  # weights x2
        + Tc * Bt * 4 * H * 4 + 2 * Bt * H * 4                       # scratch
        + 2 * (Bt * 128 + 2 * Bt * H) * 4                            # outputs x2
    )
    vmem_limit = int(max(4 * 1024 * 1024, 2 * vmem_bytes))

    kernel = functools.partial(lstm_chunk_kernel, seq_len=T, chunk=Tc)
    last_p, h_f, c_f = pl.pallas_call(
        kernel,
        out_shape=out_shapes,
        grid_spec=grid_spec,
        compiler_params=pltpu.CompilerParams(
            dimension_semantics=("parallel", "arbitrary"),  # carry over chunks
            vmem_limit_bytes=vmem_limit),
    )(emb_tm, w_ih, w_hh, b_gates, w_out_p, b_out_p)

    return last_p[:B, 0], h_f[None, :B, :], c_f[None, :B, :]


def init_params(key, nb_words, embedding_size, hidden_size):
    """Deterministic parameter init mirroring the PyTorch module's init scheme."""
    k_emb, k_wih, k_whh, k_bih, k_bhh, k_wout = jax.random.split(key, 6)
    initrange = 0.1
    lstm_scale = 1.0 / jnp.sqrt(hidden_size)   # PyTorch LSTM default init range
    E, H = embedding_size, hidden_size
    params = {
        "embedding": jax.random.uniform(k_emb, (nb_words, E), jnp.float32,
                                        -initrange, initrange),
        # stored transposed relative to PyTorch (4H, E)/(4H, H); gate order [i,f,g,o]
        "w_ih": jax.random.uniform(k_wih, (E, 4 * H), jnp.float32,
                                   -lstm_scale, lstm_scale),
        "w_hh": jax.random.uniform(k_whh, (H, 4 * H), jnp.float32,
                                   -lstm_scale, lstm_scale),
        "b_gates": (jax.random.uniform(k_bih, (1, 4 * H), jnp.float32,
                                       -lstm_scale, lstm_scale)
                    + jax.random.uniform(k_bhh, (1, 4 * H), jnp.float32,
                                         -lstm_scale, lstm_scale)),
        "w_out": jax.random.uniform(k_wout, (H, 1), jnp.float32,
                                    -initrange, initrange),
        "b_out": jnp.zeros((1, 1), jnp.float32),   # output_layer.bias.fill_(0)
    }
    return params


def reference_forward(X, params):
    """Pure-JAX reference (lax.scan LSTM, PyTorch [i,f,g,o] gate order)."""
    H = params["w_hh"].shape[0]
    B = X.shape[0]
    emb = jnp.take(params["embedding"], X, axis=0)                 # (B, T, E)
    emb_tm = jnp.transpose(emb, (1, 0, 2)).astype(jnp.bfloat16)    # (T, B, E)
    w_ih = params["w_ih"].astype(jnp.bfloat16)
    w_hh = params["w_hh"].astype(jnp.bfloat16)
    b = params["b_gates"]

    def step(carry, x_t):
        h, c = carry
        gates = (jnp.dot(x_t, w_ih, preferred_element_type=jnp.float32)
                 + jnp.dot(h.astype(jnp.bfloat16), w_hh,
                           preferred_element_type=jnp.float32)
                 + b)
        i = jax.nn.sigmoid(gates[:, 0 * H:1 * H])
        f = jax.nn.sigmoid(gates[:, 1 * H:2 * H])
        g = jnp.tanh(gates[:, 2 * H:3 * H])
        o = jax.nn.sigmoid(gates[:, 3 * H:4 * H])
        c_new = f * c + i * g
        h_new = o * jnp.tanh(c_new)
        return (h_new, c_new), None

    h0 = jnp.zeros((B, H), jnp.float32)
    c0 = jnp.zeros((B, H), jnp.float32)
    (h_f, c_f), _ = jax.lax.scan(step, (h0, c0), emb_tm)
    final = h_f @ params["w_out"] + params["b_out"]
    return final[:, 0], h_f[None], c_f[None]


if __name__ == "__main__":
    # Module defaults: embedding_size=128, hidden_size=128, n_layers=1.
    nb_words, E, H = 50, 128, 128
    B, T = 2, 10

    key = jax.random.PRNGKey(0)
    k_params, k_x = jax.random.split(key)
    params = init_params(k_params, nb_words, E, H)
    X = jax.random.randint(k_x, (B, T), 0, nb_words, dtype=jnp.int32)

    # Default path (single chunk) plus a small-chunk path that exercises the
    # cross-chunk h/c carry and the ragged-tail masking.
    final, hidden, cell = model_forward(X, params)
    final_c, hidden_c, cell_c = model_forward(X, params, max_chunk=4)
    jax.block_until_ready((final, hidden, cell, final_c, hidden_c, cell_c))

    # Verify against the pure-JAX reference (same bf16 matmul precision).
    ref_final, ref_hidden, ref_cell = reference_forward(X, params)
    assert final.shape == (B,) and hidden.shape == (1, B, H) and cell.shape == (1, B, H)
    for got in ((final, hidden, cell), (final_c, hidden_c, cell_c)):
        assert jnp.allclose(got[0], ref_final, atol=1e-2, rtol=1e-2)
        assert jnp.allclose(got[1], ref_hidden, atol=1e-2, rtol=1e-2)
        assert jnp.allclose(got[2], ref_cell, atol=1e-2, rtol=1e-2)

    print("KERNEL_OK")
</pallas_src>

<mosaic_0001>
module attributes {stable_mosaic.version = 11 : i64} {
  func.func @lstm_chunk_kernel(%arg0: i32, %arg1: i32, %arg2: memref<10x8x128xbf16, #tpu.memory_space<vmem>>, %arg3: memref<128x512xbf16, #tpu.memory_space<vmem>>, %arg4: memref<128x512xbf16, #tpu.memory_space<vmem>>, %arg5: memref<1x512xf32, #tpu.memory_space<vmem>>, %arg6: memref<128x128xf32, #tpu.memory_space<vmem>>, %arg7: memref<1x128xf32, #tpu.memory_space<vmem>>, %arg8: memref<8x128xf32, #tpu.memory_space<vmem>>, %arg9: memref<8x128xf32, #tpu.memory_space<vmem>>, %arg10: memref<8x128xf32, #tpu.memory_space<vmem>>, %arg11: memref<80x512xf32, #tpu.memory_space<vmem>>, %arg12: memref<8x128xf32, #tpu.memory_space<vmem>>, %arg13: memref<8x128xf32, #tpu.memory_space<vmem>>) attributes {dimension_semantics = [#tpu.dimension_semantics<parallel>, #tpu.dimension_semantics<arbitrary>], iteration_bounds = array<i64: 1, 1>, scalar_prefetch = 0 : i64, scratch_operands = 3 : i64, tpu.core_type = #tpu.core_type<tc>, window_params = [{transform_indices = @transform_0, window_bounds = array<i64: 10, 8, 128>}, {pipeline_mode = #tpu.pipeline_mode<synchronous>, transform_indices = @transform_1, window_bounds = array<i64: 128, 512>}, {pipeline_mode = #tpu.pipeline_mode<synchronous>, transform_indices = @transform_2, window_bounds = array<i64: 128, 512>}, {pipeline_mode = #tpu.pipeline_mode<synchronous>, transform_indices = @transform_3, window_bounds = array<i64: 1, 512>}, {pipeline_mode = #tpu.pipeline_mode<synchronous>, transform_indices = @transform_4, window_bounds = array<i64: 128, 128>}, {pipeline_mode = #tpu.pipeline_mode<synchronous>, transform_indices = @transform_5, window_bounds = array<i64: 1, 128>}, {transform_indices = @transform_6, window_bounds = array<i64: 8, 128>}, {transform_indices = @transform_7, window_bounds = array<i64: 8, 128>}, {transform_indices = @transform_8, window_bounds = array<i64: 8, 128>}]} {
    %c0_i32 = arith.constant 0 : i32
    %0 = arith.cmpi eq, %arg1, %c0_i32 : i32
    %1 = arith.extui %0 : i1 to i32
    %c0_i32_0 = arith.constant 0 : i32
    %2 = arith.cmpi ne, %1, %c0_i32_0 : i32
    scf.if %2 {
      %cst_62 = arith.constant 0.000000e+00 : f32
      %249 = vector.broadcast %cst_62 : f32 to vector<8x128xf32>
      %c0_63 = arith.constant 0 : index
      %c0_64 = arith.constant 0 : index
      %250 = vector.load %arg12[%c0_63, %c0_64] : memref<8x128xf32, #tpu.memory_space<vmem>>, vector<8x128xf32>
      tpu.vector_store %arg12[%c0_63, %c0_64], %249 {strides = array<i32>} : memref<8x128xf32, #tpu.memory_space<vmem>>, vector<8x128xf32>,
      %cst_65 = arith.constant 0.000000e+00 : f32
      %251 = vector.broadcast %cst_65 : f32 to vector<8x128xf32>
      %c0_66 = arith.constant 0 : index
      %c0_67 = arith.constant 0 : index
      %252 = vector.load %arg13[%c0_66, %c0_67] : memref<8x128xf32, #tpu.memory_space<vmem>>, vector<8x128xf32>
      tpu.vector_store %arg13[%c0_66, %c0_67], %251 {strides = array<i32>} : memref<8x128xf32, #tpu.memory_space<vmem>>, vector<8x128xf32>,
    } else {
    }
    %c0 = arith.constant 0 : index
    %c0_1 = arith.constant 0 : index
    %c0_2 = arith.constant 0 : index
    %3 = vector.load %arg2[%c0, %c0_1, %c0_2] : memref<10x8x128xbf16, #tpu.memory_space<vmem>>, vector<10x8x128xbf16>
    %4 = vector.shape_cast %3 : vector<10x8x128xbf16> to vector<80x128xbf16>
    %c0_3 = arith.constant 0 : index
    %c0_4 = arith.constant 0 : index
    %5 = vector.load %arg3[%c0_3, %c0_4] : memref<128x512xbf16, #tpu.memory_space<vmem>>, vector<128x512xbf16>
    %cst = arith.constant dense<0.000000e+00> : vector<80x512xf32>
    %6 = tpu.matmul %4, %5, %cst {dimension_numbers = #tpu.dot_dimension_numbers<[1], [0], [0], [1], [0, 0, 1, 1], [], []>} : vector<80x128xbf16>, vector<128x512xbf16>, vector<80x512xf32> -> vector<80x512xf32>
    %c0_5 = arith.constant 0 : index
    %c0_6 = arith.constant 0 : index
    %7 = vector.load %arg5[%c0_5, %c0_6] : memref<1x512xf32, #tpu.memory_space<vmem>>, vector<1x512xf32>
    %8 = vector.broadcast %7 : vector<1x512xf32> to vector<80x512xf32>
    %9 = arith.addf %6, %8 : vector<80x512xf32>
    %c0_7 = arith.constant 0 : index
    %c0_8 = arith.constant 0 : index
    %10 = vector.load %arg11[%c0_7, %c0_8] : memref<80x512xf32, #tpu.memory_space<vmem>>, vector<80x512xf32>
    tpu.vector_store %arg11[%c0_7, %c0_8], %9 {strides = array<i32>} : memref<80x512xf32, #tpu.memory_space<vmem>>, vector<80x512xf32>,
    %c0_9 = arith.constant 0 : index
    %c0_10 = arith.constant 0 : index
    %11 = vector.load %arg4[%c0_9, %c0_10] : memref<128x512xbf16, #tpu.memory_space<vmem>>, vector<128x512xbf16>
    %c0_11 = arith.constant 0 : index
    %c0_12 = arith.constant 0 : index
    %12 = vector.load %arg12[%c0_11, %c0_12] : memref<8x128xf32, #tpu.memory_space<vmem>>, vector<8x128xf32>
    %c0_13 = arith.constant 0 : index
    %c0_14 = arith.constant 0 : index
    %13 = vector.load %arg13[%c0_13, %c0_14] : memref<8x128xf32, #tpu.memory_space<vmem>>, vector<8x128xf32>
    %c0_i32_15 = arith.constant 0 : i32
    %c8_i32 = arith.constant 8 : i32
    %14 = arith.muli %c0_i32_15, %c8_i32 : i32
    %15 = tpu.assume_multiple %14, 8 : i32
    %16 = arith.index_cast %15 : i32 to index
    %c0_16 = arith.constant 0 : index
    %17 = vector.load %arg11[%16, %c0_16] : memref<80x512xf32, #tpu.memory_space<vmem>>, vector<8x512xf32>
    %18 = arith.truncf %12 : vector<8x128xf32> to vector<8x128xbf16>
    %cst_17 = arith.constant dense<0.000000e+00> : vector<8x512xf32>
    %19 = tpu.matmul %18, %11, %cst_17 {dimension_numbers = #tpu.dot_dimension_numbers<[1], [0], [0], [1], [0, 0, 1, 1], [], []>} : vector<8x128xbf16>, vector<128x512xbf16>, vector<8x512xf32> -> vector<8x512xf32>
    %20 = arith.addf %17, %19 : vector<8x512xf32>
    %21 = vector.extract_strided_slice %20 {offsets = [0, 0], sizes = [8, 384], strides = [1, 1]} : vector<8x512xf32> to vector<8x384xf32>
    %22 = arith.negf %21 : vector<8x384xf32>
    %23 = math.exp %22 : vector<8x384xf32>
    %cst_18 = arith.constant 1.000000e+00 : f32
    %24 = vector.broadcast %cst_18 : f32 to vector<8x384xf32>
    %25 = arith.addf %24, %23 : vector<8x384xf32>
    %26 = arith.divf %24, %25 : vector<8x384xf32>
    %27 = vector.extract_strided_slice %26 {offsets = [0, 0], sizes = [8, 128], strides = [1, 1]} : vector<8x384xf32> to vector<8x128xf32>
    %28 = vector.extract_strided_slice %26 {offsets = [0, 128], sizes = [8, 128], strides = [1, 1]} : vector<8x384xf32> to vector<8x128xf32>
    %29 = vector.extract_strided_slice %26 {offsets = [0, 256], sizes = [8, 128], strides = [1, 1]} : vector<8x384xf32> to vector<8x128xf32>
    %30 = vector.extract_strided_slice %20 {offsets = [0, 384], sizes = [8, 128], strides = [1, 1]} : vector<8x512xf32> to vector<8x128xf32>
    %31 = math.tanh %30 : vector<8x128xf32>
    %32 = arith.mulf %28, %13 : vector<8x128xf32>
    %33 = arith.mulf %27, %31 : vector<8x128xf32>
    %34 = arith.addf %32, %33 : vector<8x128xf32>
    %35 = math.tanh %34 : vector<8x128xf32>
    %36 = arith.mulf %29, %35 : vector<8x128xf32>
    %c1_i32 = arith.constant 1 : i32
    %c8_i32_19 = arith.constant 8 : i32
    %37 = arith.muli %c1_i32, %c8_i32_19 : i32
    %38 = tpu.assume_multiple %37, 8 : i32
    %39 = arith.index_cast %38 : i32 to index
    %c0_20 = arith.constant 0 : index
    %40 = vector.load %arg11[%39, %c0_20] : memref<80x512xf32, #tpu.memory_space<vmem>>, vector<8x512xf32>
    %41 = arith.truncf %36 : vector<8x128xf32> to vector<8x128xbf16>
    %cst_21 = arith.constant dense<0.000000e+00> : vector<8x512xf32>
    %42 = tpu.matmul %41, %11, %cst_21 {dimension_numbers = #tpu.dot_dimension_numbers<[1], [0], [0], [1], [0, 0, 1, 1], [], []>} : vector<8x128xbf16>, vector<128x512xbf16>, vector<8x512xf32> -> vector<8x512xf32>
    %43 = arith.addf %40, %42 : vector<8x512xf32>
    %44 = vector.extract_strided_slice %43 {offsets = [0, 0], sizes = [8, 384], strides = [1, 1]} : vector<8x512xf32> to vector<8x384xf32>
    %45 = arith.negf %44 : vector<8x384xf32>
    %46 = math.exp %45 : vector<8x384xf32>
    %cst_22 = arith.constant 1.000000e+00 : f32
    %47 = vector.broadcast %cst_22 : f32 to vector<8x384xf32>
    %48 = arith.addf %47, %46 : vector<8x384xf32>
    %49 = arith.divf %47, %48 : vector<8x384xf32>
    %50 = vector.extract_strided_slice %49 {offsets = [0, 0], sizes = [8, 128], strides = [1, 1]} : vector<8x384xf32> to vector<8x128xf32>
    %51 = vector.extract_strided_slice %49 {offsets = [0, 128], sizes = [8, 128], strides = [1, 1]} : vector<8x384xf32> to vector<8x128xf32>
    %52 = vector.extract_strided_slice %49 {offsets = [0, 256], sizes = [8, 128], strides = [1, 1]} : vector<8x384xf32> to vector<8x128xf32>
    %53 = vector.extract_strided_slice %43 {offsets = [0, 384], sizes = [8, 128], strides = [1, 1]} : vector<8x512xf32> to vector<8x128xf32>
    %54 = math.tanh %53 : vector<8x128xf32>
    %55 = arith.mulf %51, %34 : vector<8x128xf32>
    %56 = arith.mulf %50, %54 : vector<8x128xf32>
    %57 = arith.addf %55, %56 : vector<8x128xf32>
    %58 = math.tanh %57 : vector<8x128xf32>
    %59 = arith.mulf %52, %58 : vector<8x128xf32>
    %c2_i32 = arith.constant 2 : i32
    %c8_i32_23 = arith.constant 8 : i32
    %60 = arith.muli %c2_i32, %c8_i32_23 : i32
    %61 = tpu.assume_multiple %60, 8 : i32
    %62 = arith.index_cast %61 : i32 to index
    %c0_24 = arith.constant 0 : index
    %63 = vector.load %arg11[%62, %c0_24] : memref<80x512xf32, #tpu.memory_space<vmem>>, vector<8x512xf32>
    %64 = arith.truncf %59 : vector<8x128xf32> to vector<8x128xbf16>
    %cst_25 = arith.constant dense<0.000000e+00> : vector<8x512xf32>
    %65 = tpu.matmul %64, %11, %cst_25 {dimension_numbers = #tpu.dot_dimension_numbers<[1], [0], [0], [1], [0, 0, 1, 1], [], []>} : vector<8x128xbf16>, vector<128x512xbf16>, vector<8x512xf32> -> vector<8x512xf32>
    %66 = arith.addf %63, %65 : vector<8x512xf32>
    %67 = vector.extract_strided_slice %66 {offsets = [0, 0], sizes = [8, 384], strides = [1, 1]} : vector<8x512xf32> to vector<8x384xf32>
    %68 = arith.negf %67 : vector<8x384xf32>
    %69 = math.exp %68 : vector<8x384xf32>
    %cst_26 = arith.constant 1.000000e+00 : f32
    %70 = vector.broadcast %cst_26 : f32 to vector<8x384xf32>
    %71 = arith.addf %70, %69 : vector<8x384xf32>
    %72 = arith.divf %70, %71 : vector<8x384xf32>
    %73 = vector.extract_strided_slice %72 {offsets = [0, 0], sizes = [8, 128], strides = [1, 1]} : vector<8x384xf32> to vector<8x128xf32>
    %74 = vector.extract_strided_slice %72 {offsets = [0, 128], sizes = [8, 128], strides = [1, 1]} : vector<8x384xf32> to vector<8x128xf32>
    %75 = vector.extract_strided_slice %72 {offsets = [0, 256], sizes = [8, 128], strides = [1, 1]} : vector<8x384xf32> to vector<8x128xf32>
    %76 = vector.extract_strided_slice %66 {offsets = [0, 384], sizes = [8, 128], strides = [1, 1]} : vector<8x512xf32> to vector<8x128xf32>
    %77 = math.tanh %76 : vector<8x128xf32>
    %78 = arith.mulf %74, %57 : vector<8x128xf32>
    %79 = arith.mulf %73, %77 : vector<8x128xf32>
    %80 = arith.addf %78, %79 : vector<8x128xf32>
    %81 = math.tanh %80 : vector<8x128xf32>
    %82 = arith.mulf %75, %81 : vector<8x128xf32>
    %c3_i32 = arith.constant 3 : i32
    %c8_i32_27 = arith.constant 8 : i32
    %83 = arith.muli %c3_i32, %c8_i32_27 : i32
    %84 = tpu.assume_multiple %83, 8 : i32
    %85 = arith.index_cast %84 : i32 to index
    %c0_28 = arith.constant 0 : index
    %86 = vector.load %arg11[%85, %c0_28] : memref<80x512xf32, #tpu.memory_space<vmem>>, vector<8x512xf32>
    %87 = arith.truncf %82 : vector<8x128xf32> to vector<8x128xbf16>
    %cst_29 = arith.constant dense<0.000000e+00> : vector<8x512xf32>
    %88 = tpu.matmul %87, %11, %cst_29 {dimension_numbers = #tpu.dot_dimension_numbers<[1], [0], [0], [1], [0, 0, 1, 1], [], []>} : vector<8x128xbf16>, vector<128x512xbf16>, vector<8x512xf32> -> vector<8x512xf32>
    %89 = arith.addf %86, %88 : vector<8x512xf32>
    %90 = vector.extract_strided_slice %89 {offsets = [0, 0], sizes = [8, 384], strides = [1, 1]} : vector<8x512xf32> to vector<8x384xf32>
    %91 = arith.negf %90 : vector<8x384xf32>
    %92 = math.exp %91 : vector<8x384xf32>
    %cst_30 = arith.constant 1.000000e+00 : f32
    %93 = vector.broadcast %cst_30 : f32 to vector<8x384xf32>
    %94 = arith.addf %93, %92 : vector<8x384xf32>
    %95 = arith.divf %93, %94 : vector<8x384xf32>
    %96 = vector.extract_strided_slice %95 {offsets = [0, 0], sizes = [8, 128], strides = [1, 1]} : vector<8x384xf32> to vector<8x128xf32>
    %97 = vector.extract_strided_slice %95 {offsets = [0, 128], sizes = [8, 128], strides = [1, 1]} : vector<8x384xf32> to vector<8x128xf32>
    %98 = vector.extract_strided_slice %95 {offsets = [0, 256], sizes = [8, 128], strides = [1, 1]} : vector<8x384xf32> to vector<8x128xf32>
    %99 = vector.extract_strided_slice %89 {offsets = [0, 384], sizes = [8, 128], strides = [1, 1]} : vector<8x512xf32> to vector<8x128xf32>
    %100 = math.tanh %99 : vector<8x128xf32>
    %101 = arith.mulf %97, %80 : vector<8x128xf32>
    %102 = arith.mulf %96, %100 : vector<8x128xf32>
    %103 = arith.addf %101, %102 : vector<8x128xf32>
    %104 = math.tanh %103 : vector<8x128xf32>
    %105 = arith.mulf %98, %104 : vector<8x128xf32>
    %c4_i32 = arith.constant 4 : i32
    %c8_i32_31 = arith.constant 8 : i32
    %106 = arith.muli %c4_i32, %c8_i32_31 : i32
    %107 = tpu.assume_multiple %106, 8 : i32
    %108 = arith.index_cast %107 : i32 to index
    %c0_32 = arith.constant 0 : index
    %109 = vector.load %arg11[%108, %c0_32] : memref<80x512xf32, #tpu.memory_space<vmem>>, vector<8x512xf32>
    %110 = arith.truncf %105 : vector<8x128xf32> to vector<8x128xbf16>
    %cst_33 = arith.constant dense<0.000000e+00> : vector<8x512xf32>
    %111 = tpu.matmul %110, %11, %cst_33 {dimension_numbers = #tpu.dot_dimension_numbers<[1], [0], [0], [1], [0, 0, 1, 1], [], []>} : vector<8x128xbf16>, vector<128x512xbf16>, vector<8x512xf32> -> vector<8x512xf32>
    %112 = arith.addf %109, %111 : vector<8x512xf32>
    %113 = vector.extract_strided_slice %112 {offsets = [0, 0], sizes = [8, 384], strides = [1, 1]} : vector<8x512xf32> to vector<8x384xf32>
    %114 = arith.negf %113 : vector<8x384xf32>
    %115 = math.exp %114 : vector<8x384xf32>
    %cst_34 = arith.constant 1.000000e+00 : f32
    %116 = vector.broadcast %cst_34 : f32 to vector<8x384xf32>
    %117 = arith.addf %116, %115 : vector<8x384xf32>
    %118 = arith.divf %116, %117 : vector<8x384xf32>
    %119 = vector.extract_strided_slice %118 {offsets = [0, 0], sizes = [8, 128], strides = [1, 1]} : vector<8x384xf32> to vector<8x128xf32>
    %120 = vector.extract_strided_slice %118 {offsets = [0, 128], sizes = [8, 128], strides = [1, 1]} : vector<8x384xf32> to vector<8x128xf32>
    %121 = vector.extract_strided_slice %118 {offsets = [0, 256], sizes = [8, 128], strides = [1, 1]} : vector<8x384xf32> to vector<8x128xf32>
    %122 = vector.extract_strided_slice %112 {offsets = [0, 384], sizes = [8, 128], strides = [1, 1]} : vector<8x512xf32> to vector<8x128xf32>
    %123 = math.tanh %122 : vector<8x128xf32>
    %124 = arith.mulf %120, %103 : vector<8x128xf32>
    %125 = arith.mulf %119, %123 : vector<8x128xf32>
    %126 = arith.addf %124, %125 : vector<8x128xf32>
    %127 = math.tanh %126 : vector<8x128xf32>
    %128 = arith.mulf %121, %127 : vector<8x128xf32>
    %c5_i32 = arith.constant 5 : i32
    %c8_i32_35 = arith.constant 8 : i32
    %129 = arith.muli %c5_i32, %c8_i32_35 : i32
    %130 = tpu.assume_multiple %129, 8 : i32
    %131 = arith.index_cast %130 : i32 to index
    %c0_36 = arith.constant 0 : index
    %132 = vector.load %arg11[%131, %c0_36] : memref<80x512xf32, #tpu.memory_space<vmem>>, vector<8x512xf32>
    %133 = arith.truncf %128 : vector<8x128xf32> to vector<8x128xbf16>
    %cst_37 = arith.constant dense<0.000000e+00> : vector<8x512xf32>
    %134 = tpu.matmul %133, %11, %cst_37 {dimension_numbers = #tpu.dot_dimension_numbers<[1], [0], [0], [1], [0, 0, 1, 1], [], []>} : vector<8x128xbf16>, vector<128x512xbf16>, vector<8x512xf32> -> vector<8x512xf32>
    %135 = arith.addf %132, %134 : vector<8x512xf32>
    %136 = vector.extract_strided_slice %135 {offsets = [0, 0], sizes = [8, 384], strides = [1, 1]} : vector<8x512xf32> to vector<8x384xf32>
    %137 = arith.negf %136 : vector<8x384xf32>
    %138 = math.exp %137 : vector<8x384xf32>
    %cst_38 = arith.constant 1.000000e+00 : f32
    %139 = vector.broadcast %cst_38 : f32 to vector<8x384xf32>
    %140 = arith.addf %139, %138 : vector<8x384xf32>
    %141 = arith.divf %139, %140 : vector<8x384xf32>
    %142 = vector.extract_strided_slice %141 {offsets = [0, 0], sizes = [8, 128], strides = [1, 1]} : vector<8x384xf32> to vector<8x128xf32>
    %143 = vector.extract_strided_slice %141 {offsets = [0, 128], sizes = [8, 128], strides = [1, 1]} : vector<8x384xf32> to vector<8x128xf32>
    %144 = vector.extract_strided_slice %141 {offsets = [0, 256], sizes = [8, 128], strides = [1, 1]} : vector<8x384xf32> to vector<8x128xf32>
    %145 = vector.extract_strided_slice %135 {offsets = [0, 384], sizes = [8, 128], strides = [1, 1]} : vector<8x512xf32> to vector<8x128xf32>
    %146 = math.tanh %145 : vector<8x128xf32>
    %147 = arith.mulf %143, %126 : vector<8x128xf32>
    %148 = arith.mulf %142, %146 : vector<8x128xf32>
    %149 = arith.addf %147, %148 : vector<8x128xf32>
    %150 = math.tanh %149 : vector<8x128xf32>
    %151 = arith.mulf %144, %150 : vector<8x128xf32>
    %c6_i32 = arith.constant 6 : i32
    %c8_i32_39 = arith.constant 8 : i32
    %152 = arith.muli %c6_i32, %c8_i32_39 : i32
    %153 = tpu.assume_multiple %152, 8 : i32
    %154 = arith.index_cast %153 : i32 to index
    %c0_40 = arith.constant 0 : index
    %155 = vector.load %arg11[%154, %c0_40] : memref<80x512xf32, #tpu.memory_space<vmem>>, vector<8x512xf32>
    %156 = arith.truncf %151 : vector<8x128xf32> to vector<8x128xbf16>
    %cst_41 = arith.constant dense<0.000000e+00> : vector<8x512xf32>
    %157 = tpu.matmul %156, %11, %cst_41 {dimension_numbers = #tpu.dot_dimension_numbers<[1], [0], [0], [1], [0, 0, 1, 1], [], []>} : vector<8x128xbf16>, vector<128x512xbf16>, vector<8x512xf32> -> vector<8x512xf32>
    %158 = arith.addf %155, %157 : vector<8x512xf32>
    %159 = vector.extract_strided_slice %158 {offsets = [0, 0], sizes = [8, 384], strides = [1, 1]} : vector<8x512xf32> to vector<8x384xf32>
    %160 = arith.negf %159 : vector<8x384xf32>
    %161 = math.exp %160 : vector<8x384xf32>
    %cst_42 = arith.constant 1.000000e+00 : f32
    %162 = vector.broadcast %cst_42 : f32 to vector<8x384xf32>
    %163 = arith.addf %162, %161 : vector<8x384xf32>
    %164 = arith.divf %162, %163 : vector<8x384xf32>
    %165 = vector.extract_strided_slice %164 {offsets = [0, 0], sizes = [8, 128], strides = [1, 1]} : vector<8x384xf32> to vector<8x128xf32>
    %166 = vector.extract_strided_slice %164 {offsets = [0, 128], sizes = [8, 128], strides = [1, 1]} : vector<8x384xf32> to vector<8x128xf32>
    %167 = vector.extract_strided_slice %164 {offsets = [0, 256], sizes = [8, 128], strides = [1, 1]} : vector<8x384xf32> to vector<8x128xf32>
    %168 = vector.extract_strided_slice %158 {offsets = [0, 384], sizes = [8, 128], strides = [1, 1]} : vector<8x512xf32> to vector<8x128xf32>
    %169 = math.tanh %168 : vector<8x128xf32>
    %170 = arith.mulf %166, %149 : vector<8x128xf32>
    %171 = arith.mulf %165, %169 : vector<8x128xf32>
    %172 = arith.addf %170, %171 : vector<8x128xf32>
    %173 = math.tanh %172 : vector<8x128xf32>
    %174 = arith.mulf %167, %173 : vector<8x128xf32>
    %c7_i32 = arith.constant 7 : i32
    %c8_i32_43 = arith.constant 8 : i32
    %175 = arith.muli %c7_i32, %c8_i32_43 : i32
    %176 = tpu.assume_multiple %175, 8 : i32
    %177 = arith.index_cast %176 : i32 to index
    %c0_44 = arith.constant 0 : index
    %178 = vector.load %arg11[%177, %c0_44] : memref<80x512xf32, #tpu.memory_space<vmem>>, vector<8x512xf32>
    %179 = arith.truncf %174 : vector<8x128xf32> to vector<8x128xbf16>
    %cst_45 = arith.constant dense<0.000000e+00> : vector<8x512xf32>
    %180 = tpu.matmul %179, %11, %cst_45 {dimension_numbers = #tpu.dot_dimension_numbers<[1], [0], [0], [1], [0, 0, 1, 1], [], []>} : vector<8x128xbf16>, vector<128x512xbf16>, vector<8x512xf32> -> vector<8x512xf32>
    %181 = arith.addf %178, %180 : vector<8x512xf32>
    %182 = vector.extract_strided_slice %181 {offsets = [0, 0], sizes = [8, 384], strides = [1, 1]} : vector<8x512xf32> to vector<8x384xf32>
    %183 = arith.negf %182 : vector<8x384xf32>
    %184 = math.exp %183 : vector<8x384xf32>
    %cst_46 = arith.constant 1.000000e+00 : f32
    %185 = vector.broadcast %cst_46 : f32 to vector<8x384xf32>
    %186 = arith.addf %185, %184 : vector<8x384xf32>
    %187 = arith.divf %185, %186 : vector<8x384xf32>
    %188 = vector.extract_strided_slice %187 {offsets = [0, 0], sizes = [8, 128], strides = [1, 1]} : vector<8x384xf32> to vector<8x128xf32>
    %189 = vector.extract_strided_slice %187 {offsets = [0, 128], sizes = [8, 128], strides = [1, 1]} : vector<8x384xf32> to vector<8x128xf32>
    %190 = vector.extract_strided_slice %187 {offsets = [0, 256], sizes = [8, 128], strides = [1, 1]} : vector<8x384xf32> to vector<8x128xf32>
    %191 = vector.extract_strided_slice %181 {offsets = [0, 384], sizes = [8, 128], strides = [1, 1]} : vector<8x512xf32> to vector<8x128xf32>
    %192 = math.tanh %191 : vector<8x128xf32>
    %193 = arith.mulf %189, %172 : vector<8x128xf32>
    %194 = arith.mulf %188, %192 : vector<8x128xf32>
    %195 = arith.addf %193, %194 : vector<8x128xf32>
    %196 = math.tanh %195 : vector<8x128xf32>
    %197 = arith.mulf %190, %196 : vector<8x128xf32>
    %c8_i32_47 = arith.constant 8 : i32
    %c8_i32_48 = arith.constant 8 : i32
    %198 = arith.muli %c8_i32_47, %c8_i32_48 : i32
    %199 = tpu.assume_multiple %198, 8 : i32
    %200 = arith.index_cast %199 : i32 to index
    %c0_49 = arith.constant 0 : index
    %201 = vector.load %arg11[%200, %c0_49] : memref<80x512xf32, #tpu.memory_space<vmem>>, vector<8x512xf32>
    %202 = arith.truncf %197 : vector<8x128xf32> to vector<8x128xbf16>
    %cst_50 = arith.constant dense<0.000000e+00> : vector<8x512xf32>
    %203 = tpu.matmul %202, %11, %cst_50 {dimension_numbers = #tpu.dot_dimension_numbers<[1], [0], [0], [1], [0, 0, 1, 1], [], []>} : vector<8x128xbf16>, vector<128x512xbf16>, vector<8x512xf32> -> vector<8x512xf32>
    %204 = arith.addf %201, %203 : vector<8x512xf32>
    %205 = vector.extract_strided_slice %204 {offsets = [0, 0], sizes = [8, 384], strides = [1, 1]} : vector<8x512xf32> to vector<8x384xf32>
    %206 = arith.negf %205 : vector<8x384xf32>
    %207 = math.exp %206 : vector<8x384xf32>
    %cst_51 = arith.constant 1.000000e+00 : f32
    %208 = vector.broadcast %cst_51 : f32 to vector<8x384xf32>
    %209 = arith.addf %208, %207 : vector<8x384xf32>
    %210 = arith.divf %208, %209 : vector<8x384xf32>
    %211 = vector.extract_strided_slice %210 {offsets = [0, 0], sizes = [8, 128], strides = [1, 1]} : vector<8x384xf32> to vector<8x128xf32>
    %212 = vector.extract_strided_slice %210 {offsets = [0, 128], sizes = [8, 128], strides = [1, 1]} : vector<8x384xf32> to vector<8x128xf32>
    %213 = vector.extract_strided_slice %210 {offsets = [0, 256], sizes = [8, 128], strides = [1, 1]} : vector<8x384xf32> to vector<8x128xf32>
    %214 = vector.extract_strided_slice %204 {offsets = [0, 384], sizes = [8, 128], strides = [1, 1]} : vector<8x512xf32> to vector<8x128xf32>
    %215 = math.tanh %214 : vector<8x128xf32>
    %216 = arith.mulf %212, %195 : vector<8x128xf32>
    %217 = arith.mulf %211, %215 : vector<8x128xf32>
    %218 = arith.addf %216, %217 : vector<8x128xf32>
    %219 = math.tanh %218 : vector<8x128xf32>
    %220 = arith.mulf %213, %219 : vector<8x128xf32>
    %c9_i32 = arith.constant 9 : i32
    %c8_i32_52 = arith.constant 8 : i32
    %221 = arith.muli %c9_i32, %c8_i32_52 : i32
    %222 = tpu.assume_multiple %221, 8 : i32
    %223 = arith.index_cast %222 : i32 to index
    %c0_53 = arith.constant 0 : index
    %224 = vector.load %arg11[%223, %c0_53] : memref<80x512xf32, #tpu.memory_space<vmem>>, vector<8x512xf32>
    %225 = arith.truncf %220 : vector<8x128xf32> to vector<8x128xbf16>
    %cst_54 = arith.constant dense<0.000000e+00> : vector<8x512xf32>
    %226 = tpu.matmul %225, %11, %cst_54 {dimension_numbers = #tpu.dot_dimension_numbers<[1], [0], [0], [1], [0, 0, 1, 1], [], []>} : vector<8x128xbf16>, vector<128x512xbf16>, vector<8x512xf32> -> vector<8x512xf32>
    %227 = arith.addf %224, %226 : vector<8x512xf32>
    %228 = vector.extract_strided_slice %227 {offsets = [0, 0], sizes = [8, 384], strides = [1, 1]} : vector<8x512xf32> to vector<8x384xf32>
    %229 = arith.negf %228 : vector<8x384xf32>
    %230 = math.exp %229 : vector<8x384xf32>
    %cst_55 = arith.constant 1.000000e+00 : f32
    %231 = vector.broadcast %cst_55 : f32 to vector<8x384xf32>
    %232 = arith.addf %231, %230 : vector<8x384xf32>
    %233 = arith.divf %231, %232 : vector<8x384xf32>
    %234 = vector.extract_strided_slice %233 {offsets = [0, 0], sizes = [8, 128], strides = [1, 1]} : vector<8x384xf32> to vector<8x128xf32>
    %235 = vector.extract_strided_slice %233 {offsets = [0, 128], sizes = [8, 128], strides = [1, 1]} : vector<8x384xf32> to vector<8x128xf32>
    %236 = vector.extract_strided_slice %233 {offsets = [0, 256], sizes = [8, 128], strides = [1, 1]} : vector<8x384xf32> to vector<8x128xf32>
    %237 = vector.extract_strided_slice %227 {offsets = [0, 384], sizes = [8, 128], strides = [1, 1]} : vector<8x512xf32> to vector<8x128xf32>
    %238 = math.tanh %237 : vector<8x128xf32>
    %239 = arith.mulf %235, %218 : vector<8x128xf32>
    %240 = arith.mulf %234, %238 : vector<8x128xf32>
    %241 = arith.addf %239, %240 : vector<8x128xf32>
    %242 = math.tanh %241 : vector<8x128xf32>
    %243 = arith.mulf %236, %242 : vector<8x128xf32>
    %c10_i32 = arith.constant 10 : i32
    %c0_56 = arith.constant 0 : index
    %c0_57 = arith.constant 0 : index
    %244 = vector.load %arg12[%c0_56, %c0_57] : memref<8x128xf32, #tpu.memory_space<vmem>>, vector<8x128xf32>
    tpu.vector_store %arg12[%c0_56, %c0_57], %243 {strides = array<i32>} : memref<8x128xf32, #tpu.memory_space<vmem>>, vector<8x128xf32>,
    %c0_58 = arith.constant 0 : index
    %c0_59 = arith.constant 0 : index
    %245 = vector.load %arg13[%c0_58, %c0_59] : memref<8x128xf32, #tpu.memory_space<vmem>>, vector<8x128xf32>
    tpu.vector_store %arg13[%c0_58, %c0_59], %241 {strides = array<i32>} : memref<8x128xf32, #tpu.memory_space<vmem>>, vector<8x128xf32>,
    %c0_i32_60 = arith.constant 0 : i32
    %246 = arith.cmpi eq, %arg1, %c0_i32_60 : i32
    %247 = arith.extui %246 : i1 to i32
    %c0_i32_61 = arith.constant 0 : i32
    %248 = arith.cmpi ne, %247, %c0_i32_61 : i32
    scf.if %248 {
      %c0_62 = arith.constant 0 : index
      %c0_63 = arith.constant 0 : index
      %249 = vector.load %arg9[%c0_62, %c0_63] : memref<8x128xf32, #tpu.memory_space<vmem>>, vector<8x128xf32>
      tpu.vector_store %arg9[%c0_62, %c0_63], %243 {strides = array<i32>} : memref<8x128xf32, #tpu.memory_space<vmem>>, vector<8x128xf32>,
      %c0_64 = arith.constant 0 : index
      %c0_65 = arith.constant 0 : index
      %250 = vector.load %arg10[%c0_64, %c0_65] : memref<8x128xf32, #tpu.memory_space<vmem>>, vector<8x128xf32>
      tpu.vector_store %arg10[%c0_64, %c0_65], %241 {strides = array<i32>} : memref<8x128xf32, #tpu.memory_space<vmem>>, vector<8x128xf32>,
      %c0_66 = arith.constant 0 : index
      %c0_67 = arith.constant 0 : index
      %251 = vector.load %arg6[%c0_66, %c0_67] : memref<128x128xf32, #tpu.memory_space<vmem>>, vector<128x128xf32>
      %cst_68 = arith.constant dense<0.000000e+00> : vector<8x128xf32>
      %252 = tpu.matmul %243, %251, %cst_68 {dimension_numbers = #tpu.dot_dimension_numbers<[1], [0], [0], [1], [0, 0, 1, 1], [], []>} : vector<8x128xf32>, vector<128x128xf32>, vector<8x128xf32> -> vector<8x128xf32>
      %c0_69 = arith.constant 0 : index
      %c0_70 = arith.constant 0 : index
      %253 = vector.load %arg7[%c0_69, %c0_70] : memref<1x128xf32, #tpu.memory_space<vmem>>, vector<1x128xf32>
      %254 = vector.broadcast %253 : vector<1x128xf32> to vector<8x128xf32>
      %255 = arith.addf %252, %254 : vector<8x128xf32>
      %c0_71 = arith.constant 0 : index
      %c0_72 = arith.constant 0 : index
      %256 = vector.load %arg8[%c0_71, %c0_72] : memref<8x128xf32, #tpu.memory_space<vmem>>, vector<8x128xf32>
      tpu.vector_store %arg8[%c0_71, %c0_72], %255 {strides = array<i32>} : memref<8x128xf32, #tpu.memory_space<vmem>>, vector<8x128xf32>,
    } else {
    }
    return
  }
  func.func @transform_0(%arg0: i32, %arg1: i32) -> (i32, i32, i32) {
    %c0_i32 = arith.constant 0 : i32
    %c0_i32_0 = arith.constant 0 : i32
    return %arg1, %arg0, %c0_i32 : i32, i32, i32
  }
  func.func @transform_1(%arg0: i32, %arg1: i32) -> (i32, i32) {
    %c0_i32 = arith.constant 0 : i32
    %c0_i32_0 = arith.constant 0 : i32
    %c0_i32_1 = arith.constant 0 : i32
    return %c0_i32, %c0_i32_0 : i32, i32
  }
  func.func @transform_2(%arg0: i32, %arg1: i32) -> (i32, i32) {
    %c0_i32 = arith.constant 0 : i32
    %c0_i32_0 = arith.constant 0 : i32
    %c0_i32_1 = arith.constant 0 : i32
    return %c0_i32, %c0_i32_0 : i32, i32
  }
  func.func @transform_3(%arg0: i32, %arg1: i32) -> (i32, i32) {
    %c0_i32 = arith.constant 0 : i32
    %c0_i32_0 = arith.constant 0 : i32
    %c0_i32_1 = arith.constant 0 : i32
    return %c0_i32, %c0_i32_0 : i32, i32
  }
  func.func @transform_4(%arg0: i32, %arg1: i32) -> (i32, i32) {
    %c0_i32 = arith.constant 0 : i32
    %c0_i32_0 = arith.constant 0 : i32
    %c0_i32_1 = arith.constant 0 : i32
    return %c0_i32, %c0_i32_0 : i32, i32
  }
  func.func @transform_5(%arg0: i32, %arg1: i32) -> (i32, i32) {
    %c0_i32 = arith.constant 0 : i32
    %c0_i32_0 = arith.constant 0 : i32
    %c0_i32_1 = arith.constant 0 : i32
    return %c0_i32, %c0_i32_0 : i32, i32
  }
  func.func @transform_6(%arg0: i32, %arg1: i32) -> (i32, i32) {
    %c0_i32 = arith.constant 0 : i32
    %c0_i32_0 = arith.constant 0 : i32
    return %arg0, %c0_i32 : i32, i32
  }
  func.func @transform_7(%arg0: i32, %arg1: i32) -> (i32, i32) {
    %c0_i32 = arith.constant 0 : i32
    %c0_i32_0 = arith.constant 0 : i32
    return %arg0, %c0_i32 : i32, i32
  }
  func.func @transform_8(%arg0: i32, %arg1: i32) -> (i32, i32) {
    %c0_i32 = arith.constant 0 : i32
    %c0_i32_0 = arith.constant 0 : i32
    return %arg0, %c0_i32 : i32, i32
  }
}

</mosaic_0001>

<bundles_post_ra>
// kernel: tpu_custom_call.1
= control target key start
LH: loop header
LB: loop body
LE: loop exit
PB: predicated region body
PF: predicated region fallthrough
CT: control target
= control target key end

     0   :  { %14 = vsyncpa [#allocation6], 0  ;;  %s3467_s0 = inlined_call_operand.hbm [shape: bf16[10,8,128], index: 0, kind: input, shape index: {}]   ;;  %s3468_s1 = inlined_call_operand.hbm [shape: bf16[128,512], index: 1, kind: input, shape index: {}]   ;;  %s3469_s2 = inlined_call_operand.hbm [shape: bf16[128,512], index: 2, kind: input, shape index: {}]   ;;  %s3470_s3 = inlined_call_operand.vmem [shape: f32[1,512], index: 3, kind: input, shape index: {}]   ;;  %s3471_s4 = inlined_call_operand.hbm [shape: f32[128,128], index: 4, kind: input, shape index: {}]   ;;  %s3472_s5 = inlined_call_operand.vmem [shape: f32[1,128], index: 5, kind: input, shape index: {}]   ;;  %s3473_s6 = inlined_call_operand.hbm [shape: f32[8,128], index: 6, kind: output, shape index: {0}]   ;;  %s3474_s7 = inlined_call_operand.hbm [shape: f32[8,128], index: 7, kind: output, shape index: {1}]   ;;  %s3475_s8 = inlined_call_operand.hbm [shape: f32[8,128], index: 8, kind: output, shape index: {2}]  }
   0x1   :  { %15 = vsyncpa [#allocation9], 0 }
   0x2   :  { %16 = vsyncpa [#allocation12], 0 }
   0x3   :  { %17 = vsyncpa [#allocation7], 0 }
   0x4   :  { %18 = vsyncpa [#allocation15], 0  ;;  %s2690_s27 = smov [#allocation8]  }
   0x5   :  { %s36_s28 = sshll.u32 %s2690_s27, 4  ;;  %s37_s28 = int_to_ptr.vmem [resolvable:$true] %s36_s28 }
   0x6   :  { %s2548_s29 = scalar_lea.vmem %s37_s28, 4096  ;;  %p2553_p1 = scmp.lt.s32.totalorder %s37_s28, %s37_s28 }
   0x7   :  { %p2549_p0 = scmp.ne.s32.totalorder %s37_s28, %s2548_s29  ;;  %p2554_p2 = scmp.lt.s32.totalorder %s2548_s29, %s2548_s29 }
   0x9   :  { %p2555_p3 = por %p2554_p2, %p2553_p1 }
   0xb   :  { %p2556_p4 = pnand %p2555_p3, %p2549_p0 }
   0xd   :  { %2559 = shalt.err (!%p2556_p4)
}
   0xe   :  { %s2691_s30 = smov 256   ;;  %s2692_s9 = smov 16  }
   0xf   :  { %42 = dma.hbm_to_vmem [thread:$0]  %s3468_s1, 4096, %s37_s28, [#allocation9], %s2691_s30, %s2691_s30, %s2692_s9  }
  0x10   :  { %s2693_s12 = smov [#allocation5]  }
  0x11   :  { %s24_s13 = sshll.u32 %s2693_s12, 4  ;;  %s25_s13 = int_to_ptr.vmem [resolvable:$true] %s24_s13 }
  0x12   :  { %s2568_s14 = scalar_lea.vmem %s25_s13, 640  ;;  %p2573_p6 = scmp.lt.s32.totalorder %s25_s13, %s25_s13 }
  0x13   :  { %p2569_p5 = scmp.ne.s32.totalorder %s25_s13, %s2568_s14  ;;  %p2574_p7 = scmp.lt.s32.totalorder %s2568_s14, %s2568_s14 }
  0x15   :  { %p2575_p8 = por %p2574_p7, %p2573_p6 }
  0x17   :  { %p2576_p9 = pnand %p2575_p8, %p2569_p5 }
  0x19   :  { %2579 = shalt.err (!%p2576_p9)
}
  0x1a   :  { %s2694_s15 = smov 64   ;;  %s2695_s16 = smov 4  }
  0x1b   :  { %30 = dma.hbm_to_vmem [thread:$0]  %s3467_s0, 640, %s25_s13, [#allocation6], %s2694_s15, %s2694_s15, %s2695_s16  }
  0x1c   :  { %s2696_s19 = smov [#allocation10]   ;;  %s2697_s21 = smov [#allocation11]  }
  0x1d   :  { %s48_s20 = sshll.u32 %s2696_s19, 4  ;;  %s62_s1 = sshll.u32 %s2697_s21, 4  ;;  %s49_s20 = int_to_ptr.vmem [resolvable:$true] %s48_s20  ;;  %s63_s1 = int_to_ptr.vmem [resolvable:$true] %s62_s1 }
  0x1e   :  { %s2588_s22 = scalar_lea.vmem %s49_s20, 4096  ;;  %p2593_p11 = scmp.lt.s32.totalorder %s49_s20, %s49_s20 }
  0x1f   :  { %p2589_p10 = scmp.ne.s32.totalorder %s49_s20, %s2588_s22  ;;  %p2594_p12 = scmp.lt.s32.totalorder %s2588_s22, %s2588_s22 }
  0x21   :  { %p2595_p13 = por %p2594_p12, %p2593_p11 }
  0x23   :  { %p2596_p0 = pnand %p2595_p13, %p2589_p10 }
  0x25   :  { %2599 = shalt.err (!%p2596_p0)
}
  0x26   :  { %54 = dma.hbm_to_vmem [thread:$0]  %s3469_s2, 4096, %s49_s20, [#allocation9], %s2691_s30, %s2691_s30, %s2692_s9  }
  0x27   :  { %s2608_s0 = scalar_lea.vmem %s63_s1, 2048  ;;  %p2613_p2 = scmp.lt.s32.totalorder %s63_s1, %s63_s1 }
  0x28   :  { %p2609_p1 = scmp.ne.s32.totalorder %s63_s1, %s2608_s0  ;;  %p2614_p3 = scmp.lt.s32.totalorder %s2608_s0, %s2608_s0 }
  0x2a   :  { %p2615_p4 = por %p2614_p3, %p2613_p2 }
  0x2c   :  { %p2616_p5 = pnand %p2615_p4, %p2609_p1 }
  0x2e   :  { %2619 = shalt.err (!%p2616_p5)
}
  0x2f   :  { %s2698_s25 = smov 128   ;;  %s2699_s26 = smov 8  }
  0x30   :  { %68 = dma.hbm_to_vmem [thread:$0]  %s3471_s4, 2048, %s63_s1, [#allocation12], %s2698_s25, %s2698_s25, %s2699_s26  }
  0x31   :  { %2680 = dma.done.wait [#allocation6], 640  }
  0x32   :  { %2681 = vsyncadd [#allocation6], 4294966656 }
  0x33   :  { %2682 = dma.done.wait [#allocation9], 8192  }
  0x34   :  { %2683 = vsyncadd [#allocation9], 4294959104 }
  0x35   :  { %2684 = dma.done.wait [#allocation12], 2048  }
  0x36   :  { %2685 = vsyncadd [#allocation12], 4294965248  ;;  %v3476_v0 = vmov 0   ;;  %v2247_v1 = vld [vmem:[#allocation8 + $0xe4] ss:$16 sps:$4 sm:$0xff]   ;;  %v2295_v35 = vld [vmem:[#allocation5] sm:$0xff]  }
  0x37   :  { %376 = vmatprep.mubr.bf16.mxu0 %v3476_v0  ;;  %459 = vmatprep.mubr.bf16.mxu1 %v3476_v0  ;;  %v2249_v2 = vld [vmem:[#allocation8 + $0xec] ss:$16 sps:$4 sm:$0xff]   ;;  %v2251_v3 = vld [vmem:[#allocation8 + $0xe0] ss:$16 sps:$4 sm:$0xff]   ;;  %v2252_v4 = vld [vmem:[#allocation8 + $0xe8] ss:$16 sps:$4 sm:$0xff]  }
  0x38   :  { %344 = vmatprep.subr.bf16.mxu0 %v2247_v1  ;;  %427 = vmatprep.subr.bf16.mxu1 %v2249_v2  ;;  %v2253_v5 = vld [vmem:[#allocation8 + $0xc4] ss:$16 sps:$4 sm:$0xff]   ;;  %v2255_v6 = vld [vmem:[#allocation8 + $0xcc] ss:$16 sps:$4 sm:$0xff]   ;;  %v2257_v7 = vld [vmem:[#allocation8 + $0xc0] ss:$16 sps:$4 sm:$0xff]  }
  0x39   :  { %345 = vmatpush1.bf16.msra.mxu0 %v2251_v3  ;;  %428 = vmatpush1.bf16.msra.mxu1 %v2252_v4  ;;  %v2258_v8 = vld [vmem:[#allocation8 + $0xc8] ss:$16 sps:$4 sm:$0xff]   ;;  %v2259_v9 = vld [vmem:[#allocation8 + $0xa4] ss:$16 sps:$4 sm:$0xff]   ;;  %v2261_v10 = vld [vmem:[#allocation8 + $0xac] ss:$16 sps:$4 sm:$0xff]  }
  0x3a   :  { %346 = vmatprep.subr.bf16.mxu0 %v2253_v5  ;;  %429 = vmatprep.subr.bf16.mxu1 %v2255_v6  ;;  %v2263_v11 = vld [vmem:[#allocation8 + $0xa0] ss:$16 sps:$4 sm:$0xff]   ;;  %v2264_v12 = vld [vmem:[#allocation8 + $0xa8] ss:$16 sps:$4 sm:$0xff]   ;;  %v2265_v13 = vld [vmem:[#allocation8 + $0x84] ss:$16 sps:$4 sm:$0xff]  }
  0x3b   :  { %v2267_v14 = vld [vmem:[#allocation8 + $0x8c] ss:$16 sps:$4 sm:$0xff]   ;;  %v2269_v15 = vld [vmem:[#allocation8 + $0x80] ss:$16 sps:$4 sm:$0xff]   ;;  %v2270_v16 = vld [vmem:[#allocation8 + $0x88] ss:$16 sps:$4 sm:$0xff]  }
  0x3c   :  { %v2271_v17 = vld [vmem:[#allocation8 + $0x64] ss:$16 sps:$4 sm:$0xff]   ;;  %v2273_v18 = vld [vmem:[#allocation8 + $0x6c] ss:$16 sps:$4 sm:$0xff]   ;;  %v2275_v19 = vld [vmem:[#allocation8 + $0x60] ss:$16 sps:$4 sm:$0xff]  }
  0x3d   :  { %347 = vmatpush1.bf16.msra.mxu0 %v2257_v7  ;;  %430 = vmatpush1.bf16.msra.mxu1 %v2258_v8  ;;  %v2276_v20 = vld [vmem:[#allocation8 + $0x68] ss:$16 sps:$4 sm:$0xff]   ;;  %v2277_v21 = vld [vmem:[#allocation8 + $0x44] ss:$16 sps:$4 sm:$0xff]   ;;  %v2279_v22 = vld [vmem:[#allocation8 + $0x4c] ss:$16 sps:$4 sm:$0xff]   ;;  %v134_v8 = vlaneseq }
  0x3e   :  { %348 = vmatprep.subr.bf16.mxu0 %v2259_v9  ;;  %431 = vmatprep.subr.bf16.mxu1 %v2261_v10  ;;  %v2281_v23 = vld [vmem:[#allocation8 + $0x40] ss:$16 sps:$4 sm:$0xff]   ;;  %v2282_v24 = vld [vmem:[#allocation8 + $0x48] ss:$16 sps:$4 sm:$0xff]   ;;  %v2283_v25 = vld [vmem:[#allocation8 + $0x24] ss:$16 sps:$4 sm:$0xff]  }
  0x3f   :  { %v2285_v26 = vld [vmem:[#allocation8 + $0x2c] ss:$16 sps:$4 sm:$0xff]   ;;  %v2287_v27 = vld [vmem:[#allocation8 + $0x20] ss:$16 sps:$4 sm:$0xff]   ;;  %v2288_v28 = vld [vmem:[#allocation8 + $0x28] ss:$16 sps:$4 sm:$0xff]  }
  0x40   :  { %v2289_v29 = vld [vmem:[#allocation8 + $0x4] ss:$16 sps:$4 sm:$0xff]   ;;  %v2291_v30 = vld [vmem:[#allocation8 + $0xc] ss:$16 sps:$4 sm:$0xff]   ;;  %v2293_v31 = vld [vmem:[#allocation8] ss:$16 sps:$4 sm:$0xff]  }
  0x41   :  { %349 = vmatpush1.bf16.msra.mxu0 %v2263_v11  ;;  %432 = vmatpush1.bf16.msra.mxu1 %v2264_v12  ;;  %v2294_v32 = vld [vmem:[#allocation8 + $0x8] ss:$16 sps:$4 sm:$0xff]   ;;  %v2772_v33 = vld [vmem:[#allocation10 + $0xe4] ss:$16 sps:$4 sm:$0xff]   ;;  %v2774_v34 = vld [vmem:[#allocation10 + $0xec] ss:$16 sps:$4 sm:$0xff]  }
  0x42   :  { %350 = vmatprep.subr.bf16.mxu0 %v2265_v13  ;;  %433 = vmatprep.subr.bf16.mxu1 %v2267_v14  ;;  %v2776_v36 = vld [vmem:[#allocation10 + $0xe0] ss:$16 sps:$4 sm:$0xff]   ;;  %v2779_v37 = vld [vmem:[#allocation10 + $0xc4] ss:$16 sps:$4 sm:$0xff]   ;;  %v2782_v38 = vld [vmem:[#allocation10 + $0xe8] ss:$16 sps:$4 sm:$0xff]  }
  0x43   :  { %v2784_v39 = vld [vmem:[#allocation10 + $0xcc] ss:$16 sps:$4 sm:$0xff]   ;;  %v2787_v40 = vld [vmem:[#allocation10 + $0xc0] ss:$16 sps:$4 sm:$0xff]   ;;  %v2792_v41 = vld [vmem:[#allocation10 + $0xa4] ss:$16 sps:$4 sm:$0xff]  }
  0x44   :  { %v2795_v42 = vld [vmem:[#allocation10 + $0xc8] ss:$16 sps:$4 sm:$0xff]   ;;  %v2302_v43 = vld [vmem:[#allocation5 + $0x8] sm:$0xff]   ;;  %v2805_v46 = vld [vmem:[#allocation10 + $0xac] ss:$16 sps:$4 sm:$0xff]   ;;  %v2701_v7 = vmov 0.0|0.0  }
  0x45   :  { %351 = vmatpush1.bf16.msra.mxu0 %v2269_v15  ;;  %434 = vmatpush1.bf16.msra.mxu1 %v2270_v16  ;;  %v2799_v44 = vld [vmem:[#allocation10 + $0xa0] ss:$16 sps:$4 sm:$0xff]   ;;  %v2802_v45 = vld [vmem:[#allocation10 + $0x84] ss:$16 sps:$4 sm:$0xff]   ;;  %v2807_v47 = vld [vmem:[#allocation10 + $0xa8] ss:$16 sps:$4 sm:$0xff]  }
  0x46   :  { %352 = vmatprep.subr.bf16.mxu0 %v2271_v17  ;;  %435 = vmatprep.subr.bf16.mxu1 %v2273_v18  ;;  %v2811_v48 = vld [vmem:[#allocation10 + $0x80] ss:$16 sps:$4 sm:$0xff]   ;;  %v2813_v49 = vld [vmem:[#allocation10 + $0x8c] ss:$16 sps:$4 sm:$0xff]   ;;  %v2817_v50 = vld [vmem:[#allocation10 + $0x64] ss:$16 sps:$4 sm:$0xff]  }
  0x47   :  { %v2314_v51 = vld [vmem:[#allocation5 + $0x10] sm:$0xff]   ;;  %v2823_v52 = vld [vmem:[#allocation10 + $0x60] ss:$16 sps:$4 sm:$0xff]   ;;  %v2830_v55 = vld [vmem:[#allocation10 + $0x44] ss:$16 sps:$4 sm:$0xff]   ;;  %v135_v9 = vshrl.u32 %v134_v8, 7 }
  0x48   :  { %v2825_v53 = vld [vmem:[#allocation10 + $0x88] ss:$16 sps:$4 sm:$0xff]   ;;  %v2828_v54 = vld [vmem:[#allocation10 + $0x6c] ss:$16 sps:$4 sm:$0xff]   ;;  %v2836_v57 = vld [vmem:[#allocation10 + $0x40] ss:$16 sps:$4 sm:$0xff]  }
  0x49   :  { %353 = vmatpush1.bf16.msra.mxu0 %v2275_v19  ;;  %436 = vmatpush1.bf16.msra.mxu1 %v2276_v20  ;;  %v2834_v56 = vld [vmem:[#allocation10 + $0x68] ss:$16 sps:$4 sm:$0xff]   ;;  %v2840_v58 = vld [vmem:[#allocation10 + $0x4c] ss:$16 sps:$4 sm:$0xff]   ;;  %v2842_v59 = vld [vmem:[#allocation10 + $0x24] ss:$16 sps:$4 sm:$0xff]  }
  0x4a   :  { %354 = vmatprep.subr.bf16.mxu0 %v2277_v21  ;;  %437 = vmatprep.subr.bf16.mxu1 %v2279_v22  ;;  %v2325_v60 = vld [vmem:[#allocation5 + $0x18] sm:$0xff]   ;;  %v2848_v61 = vld [vmem:[#allocation10 + $0x48] ss:$16 sps:$4 sm:$0xff]   ;;  %v2854_v63 = vld [vmem:[#allocation10 + $0x2c] ss:$16 sps:$4 sm:$0xff]   ;;  %v144_v10 = vsub.s32 2, %v135_v9 }
  0x4b   :  { %v2852_v62 = vld [vmem:[#allocation10 + $0x20] ss:$16 sps:$4 sm:$0xff]   ;;  %v2856_v1 = vld [vmem:[#allocation10 + $0x4] ss:$16 sps:$4 sm:$0xff]   ;;  %v2860_v2 = vld [vmem:[#allocation10 + $0x28] ss:$16 sps:$4 sm:$0xff]  }
  0x4c   :  { %v2864_v3 = vld [vmem:[#allocation10] ss:$16 sps:$4 sm:$0xff]   ;;  %v2866_v4 = vld [vmem:[#allocation10 + $0xc] ss:$16 sps:$4 sm:$0xff]   ;;  %v2871_v6 = vld [vmem:[#allocation10 + $0x8] ss:$16 sps:$4 sm:$0xff]  }
  0x4d   :  { %355 = vmatpush1.bf16.msra.mxu0 %v2281_v23  ;;  %438 = vmatpush1.bf16.msra.mxu1 %v2282_v24  ;;  %v2338_v5 = vld [vmem:[#allocation5 + $0x20] sm:$0xff]   ;;  %v136_v11 = vsub.s32 0, %v135_v9  ;;  %v148_v12 = vsub.s32 3, %v135_v9  ;;  %v140_v17 = vsub.s32 1, %v135_v9  ;;  %vm2703_vm0 = vmmov 0  }
  0x4e   :  { %356 = vmatprep.subr.bf16.mxu0 %v2283_v25  ;;  %439 = vmatprep.subr.bf16.mxu1 %v2285_v26  ;;  %v132_v13 = vld [vmem:[%s3470_s3] sm:$0xf]  ;;  %s2704_s3 = smov [#allocation14]  }
  0x4f   :  { %v2921_v16 = vrot.slane %v132_v13, %v144_v10  ;;  %v2927_v20 = vrot.slane %v132_v13, %v136_v11  ;;  %v2929_v21 = vrot.slane %v132_v13, %v148_v12  ;;  %v2931_v24 = vrot.slane %v132_v13, %v140_v17  ;;  %s2041_s29 = sshll.u32 %s2704_s3, 4  ;;  %s2042_s29 = int_to_ptr.vmem [resolvable:$true] %s2041_s29 }
  0x50   :  { %s2620_s30 = scalar_lea.vmem %s2042_s29, 128  ;;  %p2625_p7 = scmp.lt.s32.totalorder %s2042_s29, %s2042_s29 }
  0x51   :  { %357 = vmatpush1.bf16.msra.mxu0 %v2287_v27  ;;  %440 = vmatpush1.bf16.msra.mxu1 %v2288_v28  ;;  %p2621_p6 = scmp.ne.s32.totalorder %s2042_s29, %s2620_s30  ;;  %p2626_p8 = scmp.lt.s32.totalorder %s2620_s30, %s2620_s30 }
  0x52   :  { %358 = vmatprep.subr.bf16.mxu0 %v2289_v29  ;;  %441 = vmatprep.subr.bf16.mxu1 %v2291_v30 }
  0x53   :  { %p2627_p9 = por %p2626_p8, %p2625_p7 }
  0x55   :  { %359 = vmatpush1.bf16.msra.mxu0 %v2293_v31  ;;  %442 = vmatpush1.bf16.msra.mxu1 %v2294_v32  ;;  %p2628_p10 = pnand %p2627_p9, %p2621_p6 }
  0x56   :  { %752 = vmatprep.subr.bf16.mxu0 %v2772_v33  ;;  %793 = vmatprep.subr.bf16.mxu1 %v2774_v34 }
  0x58   :  { %377 = vmatmul.mubr.bf16.vlgmr.msra.gmra.mxu0 %v2295_v35  ;;  %460 = vmatmul.mubr.bf16.vlgmr.msra.gmra.mxu1 %v2295_v35 }
  0x59   :  { %753 = vmatpush1.bf16.msra.mxu0 %v2776_v36  ;;  %386 = vmatprep.mubr.bf16.mxu0 %v3476_v0 }
  0x5a   :  { %754 = vmatprep.subr.bf16.mxu0 %v2779_v37  ;;  %469 = vmatprep.mubr.bf16.mxu1 %v3476_v0 }
  0x5b   :  { %794 = vmatpush1.bf16.msra.mxu1 %v2782_v38 }
  0x5c   :  { %795 = vmatprep.subr.bf16.mxu1 %v2784_v39 }
  0x5d   :  { %755 = vmatpush1.bf16.msra.mxu0 %v2787_v40 }
  0x5e   :  { %756 = vmatprep.subr.bf16.mxu0 %v2792_v41 }
  0x5f   :  { %796 = vmatpush1.bf16.msra.mxu1 %v2795_v42 }
  0x60   :  { %387 = vmatmul.mubr.bf16.gmra.mxu0 %v2302_v43  ;;  %470 = vmatmul.mubr.bf16.gmra.mxu1 %v2302_v43 }
  0x61   :  { %757 = vmatpush1.bf16.msra.mxu0 %v2799_v44  ;;  %396 = vmatprep.mubr.bf16.mxu0 %v3476_v0 }
  0x62   :  { %479 = vmatprep.mubr.bf16.mxu1 %v3476_v0  ;;  %758 = vmatprep.subr.bf16.mxu0 %v2802_v45 }
  0x63   :  { %797 = vmatprep.subr.bf16.mxu1 %v2805_v46 }
  0x64   :  { %798 = vmatpush1.bf16.msra.mxu1 %v2807_v47 }
  0x65   :  { %759 = vmatpush1.bf16.msra.mxu0 %v2811_v48  ;;  %799 = vmatprep.subr.bf16.mxu1 %v2813_v49 }
  0x66   :  { %760 = vmatprep.subr.bf16.mxu0 %v2817_v50 }
  0x68   :  { %397 = vmatmul.mubr.bf16.gmra.mxu0 %v2314_v51  ;;  %480 = vmatmul.mubr.bf16.gmra.mxu1 %v2314_v51 }
  0x69   :  { %761 = vmatpush1.bf16.msra.mxu0 %v2823_v52  ;;  %800 = vmatpush1.bf16.msra.mxu1 %v2825_v53 }
  0x6a   :  { %406 = vmatprep.mubr.bf16.mxu0 %v3476_v0  ;;  %489 = vmatprep.mubr.bf16.mxu1 %v3476_v0 }
  0x6b   :  { %801 = vmatprep.subr.bf16.mxu1 %v2828_v54  ;;  %762 = vmatprep.subr.bf16.mxu0 %v2830_v55 }
  0x6d   :  { %802 = vmatpush1.bf16.msra.mxu1 %v2834_v56  ;;  %763 = vmatpush1.bf16.msra.mxu0 %v2836_v57 }
  0x6e   :  { %803 = vmatprep.subr.bf16.mxu1 %v2840_v58  ;;  %764 = vmatprep.subr.bf16.mxu0 %v2842_v59 }
  0x70   :  { %407 = vmatmul.mubr.bf16.gmra.mxu0 %v2325_v60  ;;  %490 = vmatmul.mubr.bf16.gmra.mxu1 %v2325_v60 }
  0x71   :  { %804 = vmatpush1.bf16.msra.mxu1 %v2848_v61  ;;  %416 = vmatprep.mubr.bf16.mxu0 %v3476_v0 }
  0x72   :  { %499 = vmatprep.mubr.bf16.mxu1 %v3476_v0  ;;  %765 = vmatpush1.bf16.msra.mxu0 %v2852_v62 }
  0x73   :  { %805 = vmatprep.subr.bf16.mxu1 %v2854_v63  ;;  %766 = vmatprep.subr.bf16.mxu0 %v2856_v1 }
  0x75   :  { %806 = vmatpush1.bf16.msra.mxu1 %v2860_v2 }
  0x76   :  { %767 = vmatpush1.bf16.msra.mxu0 %v2864_v3  ;;  %807 = vmatprep.subr.bf16.mxu1 %v2866_v4 }
  0x77   :  { %870 = vmatprep.subr.bf16.mxu0 %v2772_v33 }
  0x78   :  { %417 = vmatmul.mubr.bf16.gmra.mxu0 %v2338_v5  ;;  %500 = vmatmul.mubr.bf16.gmra.mxu1 %v2338_v5 }
  0x79   :  { %808 = vmatpush1.bf16.msra.mxu1 %v2871_v6  ;;  %784 = vmatprep.mubr.bf16.mxu0 %v3476_v0 }
  0x7a   :  { %825 = vmatprep.mubr.bf16.mxu1 %v3476_v0  ;;  %911 = vmatprep.subr.bf16.mxu1 %v2774_v34 }
  0x80   :  { %785 = vmatmul.mubr.bf16.vlgmr.msra.gmra.mxu0 %v2701_v7  ;;  %826 = vmatmul.mubr.bf16.vlgmr.msra.gmra.mxu1 %v2701_v7 }
  0x81   :  { %871 = vmatpush1.bf16.msra.mxu0 %v2776_v36  ;;  %912 = vmatpush1.bf16.msra.mxu1 %v2782_v38 }
  0x82   :  { %872 = vmatprep.subr.bf16.mxu0 %v2779_v37  ;;  %913 = vmatprep.subr.bf16.mxu1 %v2784_v39 }
  0x83   :  { %902 = vmatprep.mubr.bf16.mxu0 %v3476_v0  ;;  %943 = vmatprep.mubr.bf16.mxu1 %v3476_v0 }
  0x85   :  { %873 = vmatpush1.bf16.msra.mxu0 %v2787_v40  ;;  %914 = vmatpush1.bf16.msra.mxu1 %v2795_v42 }
  0x86   :  { %874 = vmatprep.subr.bf16.mxu0 %v2792_v41  ;;  %915 = vmatprep.subr.bf16.mxu1 %v2805_v46 }
  0x89   :  { %875 = vmatpush1.bf16.msra.mxu0 %v2799_v44  ;;  %916 = vmatpush1.bf16.msra.mxu1 %v2807_v47 }
  0x8a   :  { %876 = vmatprep.subr.bf16.mxu0 %v2802_v45  ;;  %917 = vmatprep.subr.bf16.mxu1 %v2813_v49 }
  0x8d   :  { %877 = vmatpush1.bf16.msra.mxu0 %v2811_v48  ;;  %918 = vmatpush1.bf16.msra.mxu1 %v2825_v53 }
  0x8e   :  { %878 = vmatprep.subr.bf16.mxu0 %v2817_v50  ;;  %919 = vmatprep.subr.bf16.mxu1 %v2828_v54 }
  0x91   :  { %879 = vmatpush1.bf16.msra.mxu0 %v2823_v52  ;;  %920 = vmatpush1.bf16.msra.mxu1 %v2834_v56 }
  0x92   :  { %880 = vmatprep.subr.bf16.mxu0 %v2830_v55  ;;  %921 = vmatprep.subr.bf16.mxu1 %v2840_v58 }
  0x95   :  { %881 = vmatpush1.bf16.msra.mxu0 %v2836_v57  ;;  %922 = vmatpush1.bf16.msra.mxu1 %v2848_v61 }
  0x96   :  { %882 = vmatprep.subr.bf16.mxu0 %v2842_v59  ;;  %923 = vmatprep.subr.bf16.mxu1 %v2854_v63 }
  0x99   :  { %883 = vmatpush1.bf16.msra.mxu0 %v2852_v62  ;;  %924 = vmatpush1.bf16.msra.mxu1 %v2860_v2 }
  0x9a   :  { %884 = vmatprep.subr.bf16.mxu0 %v2856_v1  ;;  %925 = vmatprep.subr.bf16.mxu1 %v2866_v4 }
  0x9d   :  { %885 = vmatpush1.bf16.msra.mxu0 %v2864_v3  ;;  %926 = vmatpush1.bf16.msra.mxu1 %v2871_v6 }
  0x9e   :  { %988 = vmatprep.subr.bf16.mxu0 %v2772_v33  ;;  %1029 = vmatprep.subr.bf16.mxu1 %v2774_v34 }
 0x118   :  { %v2917_v14 = vpop.f32.mrf.mxu0  ;;  %v2919_v15 = vpop.f32.mrf.mxu1 }
 0x11a   :  { %v2923_v18 = vpop.f32.mrf.mxu0  ;;  %v2925_v19 = vpop.f32.mrf.mxu1 }
 0x11c   :  { %v382_v22 = vpop.f32.mrf.mxu0  ;;  %v465_v23 = vpop.f32.mrf.mxu1 }
 0x11d   :  { %v2934_v25 = vadd.f32 %v382_v22, %v2927_v20  ;;  %v2937_v26 = vadd.f32 %v465_v23, %v2921_v16 }
 0x11e   :  { %v384_v27 = vpop.f32.mrf.mxu0  ;;  %v467_v28 = vpop.f32.mrf.mxu1 }
 0x11f   :  { %v2940_v29 = vadd.f32 %v384_v27, %v2931_v24  ;;  %v2943_v30 = vadd.f32 %v467_v28, %v2929_v21 }
 0x120   :  { %v388_v31 = vpop.f32.mrf.mxu0  ;;  %v471_v32 = vpop.f32.mrf.mxu1 }
 0x121   :  { %v2946_v35 = vadd.f32 %v388_v31, %v2927_v20  ;;  %v2949_v43 = vadd.f32 %v471_v32, %v2921_v16 }
 0x122   :  { %v390_v51 = vpop.f32.mrf.mxu0  ;;  %v473_v60 = vpop.f32.mrf.mxu1 }
 0x123   :  { %v2952_v5 = vadd.f32 %v390_v51, %v2931_v24  ;;  %v2955_v7 = vadd.f32 %v473_v60, %v2929_v21 }
 0x124   :  { %v392_v8 = vpop.f32.mrf.mxu0  ;;  %v475_v9 = vpop.f32.mrf.mxu1 }
 0x125   :  { %v2958_v10 = vadd.f32 %v392_v8, %v2927_v20  ;;  %v2961_v11 = vadd.f32 %v475_v9, %v2921_v16 }
 0x126   :  { %v394_v12 = vpop.f32.mrf.mxu0  ;;  %v477_v13 = vpop.f32.mrf.mxu1 }
 0x127   :  { %3478 = vst [vmem:[#allocation22_spill] sm:$0xff] %v2961_v11  ;;  %v2964_v17 = vadd.f32 %v394_v12, %v2931_v24  ;;  %v2967_v22 = vadd.f32 %v477_v13, %v2929_v21 }
 0x128   :  { %v398_v23 = vpop.f32.mrf.mxu0  ;;  %v481_v27 = vpop.f32.mrf.mxu1 }
 0x129   :  { %3479 = vst [vmem:[#allocation23_spill] sm:$0xff] %v2964_v17  ;;  %3480 = vst [vmem:[#allocation24_spill] sm:$0xff] %v2967_v22  ;;  %v2970_v28 = vadd.f32 %v398_v23, %v2927_v20  ;;  %v2973_v31 = vadd.f32 %v481_v27, %v2921_v16 }
 0x12a   :  { %v400_v32 = vpop.f32.mrf.mxu0  ;;  %v483_v51 = vpop.f32.mrf.mxu1 }
 0x12b   :  { %3481 = vst [vmem:[#allocation25_spill] sm:$0xff] %v2970_v28  ;;  %3482 = vst [vmem:[#allocation26_spill] sm:$0xff] %v2973_v31  ;;  %v2976_v60 = vadd.f32 %v400_v32, %v2931_v24  ;;  %v2979_v8 = vadd.f32 %v483_v51, %v2929_v21 }
 0x12c   :  { %v402_v9 = vpop.f32.mrf.mxu0  ;;  %v485_v12 = vpop.f32.mrf.mxu1 }
 0x12d   :  { %3483 = vst [vmem:[#allocation27_spill] sm:$0xff] %v2976_v60  ;;  %3484 = vst [vmem:[#allocation28_spill] sm:$0xff] %v2979_v8  ;;  %v2982_v13 = vadd.f32 %v402_v9, %v2927_v20  ;;  %v2985_v0 = vadd.f32 %v485_v12, %v2921_v16 }
 0x12e   :  { %v404_v23 = vpop.f32.mrf.mxu0  ;;  %v487_v28 = vpop.f32.mrf.mxu1 }
 0x12f   :  { %3485 = vst [vmem:[#allocation29_spill] sm:$0xff] %v2982_v13  ;;  %3486 = vst [vmem:[#allocation30_spill] sm:$0xff] %v2985_v0  ;;  %v2988_v27 = vadd.f32 %v404_v23, %v2931_v24  ;;  %v2991_v31 = vadd.f32 %v487_v28, %v2929_v21 }
 0x130   :  { %v408_v32 = vpop.f32.mrf.mxu0  ;;  %v491_v60 = vpop.f32.mrf.mxu1 }
 0x131   :  { %3487 = vst [vmem:[#allocation31_spill] sm:$0xff] %v2988_v27  ;;  %3488 = vst [vmem:[#allocation32_spill] sm:$0xff] %v2991_v31  ;;  %v2994_v51 = vadd.f32 %v408_v32, %v2927_v20  ;;  %v2997_v8 = vadd.f32 %v491_v60, %v2921_v16 }
 0x132   :  { %v410_v9 = vpop.f32.mrf.mxu0  ;;  %v493_v13 = vpop.f32.mrf.mxu1 }
 0x133   :  { %3489 = vst [vmem:[#allocation33_spill] sm:$0xff] %v2994_v51  ;;  %3490 = vst [vmem:[#allocation34_spill] sm:$0xff] %v2997_v8  ;;  %v3000_v12 = vadd.f32 %v410_v9, %v2931_v24  ;;  %v3003_v0 = vadd.f32 %v493_v13, %v2929_v21 }
 0x134   :  { %v412_v23 = vpop.f32.mrf.mxu0  ;;  %v495_v27 = vpop.f32.mrf.mxu1 }
 0x135   :  { %3491 = vst [vmem:[#allocation35_spill] sm:$0xff] %v3000_v12  ;;  %3492 = vst [vmem:[#allocation36_spill] sm:$0xff] %v3003_v0  ;;  %v3006_v28 = vadd.f32 %v412_v23, %v2927_v20  ;;  %v3009_v31 = vadd.f32 %v495_v27, %v2921_v16 }
 0x136   :  { %v414_v32 = vpop.f32.mrf.mxu0  ;;  %v497_v51 = vpop.f32.mrf.mxu1 }
 0x137   :  { %3493 = vst [vmem:[#allocation37_spill] sm:$0xff] %v3006_v28  ;;  %3494 = vst [vmem:[#allocation38_spill] sm:$0xff] %v3009_v31  ;;  %v3012_v60 = vadd.f32 %v414_v32, %v2931_v24  ;;  %v3015_v8 = vadd.f32 %v497_v51, %v2929_v21 }
 0x138   :  { %v418_v9 = vpop.f32.mrf.mxu0  ;;  %v501_v12 = vpop.f32.mrf.mxu1 }
 0x139   :  { %3495 = vst [vmem:[#allocation39_spill] sm:$0xff] %v3012_v60  ;;  %3496 = vst [vmem:[#allocation40_spill] sm:$0xff] %v3015_v8  ;;  %v3018_v13 = vadd.f32 %v418_v9, %v2927_v20  ;;  %v3021_v0 = vadd.f32 %v501_v12, %v2921_v16  ;;  %v379_v12 = vadd.f32 %v2917_v14, %v2927_v20 }
 0x13a   :  { %v420_v23 = vpop.f32.mrf.mxu0  ;;  %v503_v28 = vpop.f32.mrf.mxu1 }
 0x13b   :  { %3497 = vst [vmem:[#allocation41_spill] sm:$0xff] %v3018_v13  ;;  %3498 = vst [vmem:[#allocation42_spill] sm:$0xff] %v3021_v0  ;;  %v3024_v27 = vadd.f32 %v420_v23, %v2931_v24  ;;  %v3027_v31 = vadd.f32 %v503_v28, %v2929_v21 }
 0x13c   :  { %v422_v32 = vpop.f32.mrf.mxu0  ;;  %v505_v60 = vpop.f32.mrf.mxu1 }
 0x13d   :  { %3499 = vst [vmem:[#allocation43_spill] sm:$0xff] %v3024_v27  ;;  %3500 = vst [vmem:[#allocation44_spill] sm:$0xff] %v3027_v31  ;;  %v3030_v51 = vadd.f32 %v422_v32, %v2927_v20  ;;  %v3033_v8 = vadd.f32 %v505_v60, %v2921_v16  ;;  %v381_v32 = vadd.f32 %v2923_v18, %v2931_v24 }
 0x13e   :  { %v424_v9 = vpop.f32.mrf.mxu0  ;;  %v507_v13 = vpop.f32.mrf.mxu1 }
 0x13f   :  { %3501 = vst [vmem:[#allocation45_spill] sm:$0xff] %v3030_v51  ;;  %3502 = vst [vmem:[#allocation46_spill] sm:$0xff] %v3033_v8  ;;  %v3038_v0 = vadd.f32 %v424_v9, %v2931_v24  ;;  %v3041_v23 = vadd.f32 %v507_v13, %v2929_v21  ;;  %v462_v13 = vadd.f32 %v2919_v15, %v2921_v16 }
 0x140   :  { %v786_v28 = vpop.f32.mrf.mxu0  ;;  %v827_v31 = vpop.f32.mrf.mxu1 }
 0x141   :  { %3503 = vst [vmem:[#allocation47_spill] sm:$0xff] %v3038_v0  ;;  %3504 = vst [vmem:[#allocation48_spill] sm:$0xff] %v3041_v23  ;;  %v834_v51 = vadd.f32 %v786_v28, %v379_v12  ;;  %v836_v23 = vadd.f32 %v827_v31, %v462_v13  ;;  %v464_v0 = vadd.f32 %v2925_v19, %v2929_v21 }
 0x142   :  { %v788_v27 = vpop.f32.mrf.mxu0  ;;  %v829_v60 = vpop.f32.mrf.mxu1 }
 0x143   :  { %v2147_v8 = vmul.f32 -1.442695, %v834_v51  ;;  %v835_v22 = vadd.f32 %v788_v27, %v381_v32  ;;  %v2149_v18 = vmul.f32 -1.442695, %v836_v23  ;;  %v837_v12 = vadd.f32 %v829_v60, %v464_v0 }
 0x144   :  { %v790_v11 = vpop.f32.mrf.mxu0  ;;  %v831_v17 = vpop.f32.mrf.mxu1  ;;  %v3505_v60 = vmov 0  }
 0x145   :  { %2348 = vpow2.f32 %v2147_v8  ;;  %v2148_v14 = vmul.f32 -1.442695, %v835_v22 }
 0x146   :  { %v791_v20 = vpop.f32.mrf.mxu0  ;;  %v832_v9 = vpop.f32.mrf.mxu1 }
 0x147   :  { %2350 = vpow2.f32 %v2148_v14 }
 0x148   :  { %2352 = vpow2.f32 %v2149_v18 }
 0x152   :  { %v2349_v24 = vpop.eup %2348 }
 0x153   :  { %v847_v28 = vadd.f32 1.0, %v2349_v24 }
 0x154   :  { %v2351_v51 = vpop.eup %2350 }
 0x155   :  { %2354 = vrcp.f32 %v847_v28  ;;  %v848_v11 = vadd.f32 1.0, %v2351_v51  ;;  %v2353_v17 = vpop.eup %2352 }
 0x156   :  { %2356 = vtanh.f32 %v837_v12  ;;  %v849_v32 = vadd.f32 1.0, %v2353_v17 }
 0x157   :  { %2358 = vrcp.f32 %v848_v11 }
 0x158   :  { %2360 = vrcp.f32 %v849_v32 }
 0x162   :  { %v2355_v22 = vpop.eup %2354 }
 0x163   :  { %v2357_v8 = vpop.eup %2356 }
 0x164   :  { %v2359_v27 = vpop.eup %2358  ;;  %v858_v16 = vmul.f32 %v2357_v8, %v2355_v22 }
 0x165   :  { %v857_v15 = vmul.f32 0.0, %v2359_v27  ;;  %v2361_v0 = vpop.eup %2360 }
 0x167   :  { %v3049_v31 = vadd.f32 %v858_v16, %v857_v15 }
 0x169   :  { %2362 = vtanh.f32 %v3049_v31 }
 0x176   :  { %v2363_v19 = vpop.eup %2362 }
 0x177   :  { %v861_v21 = vmul.f32 %v2363_v19, %v2361_v0 }
 0x179   :  { %v869_v23 = vpack.c.bf16 %v861_v21, %v861_v21 }
 0x17b   :  { %903 = vmatmul.mubr.bf16.vlgmr.msra.gmra.mxu0 %v869_v23  ;;  %944 = vmatmul.mubr.bf16.vlgmr.msra.gmra.mxu1 %v869_v23 }
 0x17c   :  { %989 = vmatpush1.bf16.msra.mxu0 %v2776_v36  ;;  %1030 = vmatpush1.bf16.msra.mxu1 %v2782_v38 }
 0x17d   :  { %990 = vmatprep.subr.bf16.mxu0 %v2779_v37  ;;  %1031 = vmatprep.subr.bf16.mxu1 %v2784_v39 }
 0x17e   :  { %1020 = vmatprep.mubr.bf16.mxu0 %v3505_v60  ;;  %1061 = vmatprep.mubr.bf16.mxu1 %v3505_v60 }
 0x180   :  { %991 = vmatpush1.bf16.msra.mxu0 %v2787_v40  ;;  %1032 = vmatpush1.bf16.msra.mxu1 %v2795_v42 }
 0x181   :  { %992 = vmatprep.subr.bf16.mxu0 %v2792_v41  ;;  %1033 = vmatprep.subr.bf16.mxu1 %v2805_v46 }
 0x184   :  { %993 = vmatpush1.bf16.msra.mxu0 %v2799_v44  ;;  %1034 = vmatpush1.bf16.msra.mxu1 %v2807_v47 }
 0x185   :  { %994 = vmatprep.subr.bf16.mxu0 %v2802_v45  ;;  %1035 = vmatprep.subr.bf16.mxu1 %v2813_v49 }
 0x188   :  { %995 = vmatpush1.bf16.msra.mxu0 %v2811_v48  ;;  %1036 = vmatpush1.bf16.msra.mxu1 %v2825_v53 }
 0x189   :  { %996 = vmatprep.subr.bf16.mxu0 %v2817_v50  ;;  %1037 = vmatprep.subr.bf16.mxu1 %v2828_v54 }
 0x18c   :  { %997 = vmatpush1.bf16.msra.mxu0 %v2823_v52  ;;  %1038 = vmatpush1.bf16.msra.mxu1 %v2834_v56 }
 0x18d   :  { %998 = vmatprep.subr.bf16.mxu0 %v2830_v55  ;;  %1039 = vmatprep.subr.bf16.mxu1 %v2840_v58 }
 0x190   :  { %999 = vmatpush1.bf16.msra.mxu0 %v2836_v57  ;;  %1040 = vmatpush1.bf16.msra.mxu1 %v2848_v61 }
 0x191   :  { %1000 = vmatprep.subr.bf16.mxu0 %v2842_v59  ;;  %1041 = vmatprep.subr.bf16.mxu1 %v2854_v63 }
 0x194   :  { %1001 = vmatpush1.bf16.msra.mxu0 %v2852_v62  ;;  %1042 = vmatpush1.bf16.msra.mxu1 %v2860_v2 }
 0x195   :  { %1002 = vmatprep.subr.bf16.mxu0 %v2856_v1  ;;  %1043 = vmatprep.subr.bf16.mxu1 %v2866_v4 }
 0x198   :  { %1003 = vmatpush1.bf16.msra.mxu0 %v2864_v3  ;;  %1044 = vmatpush1.bf16.msra.mxu1 %v2871_v6 }
 0x199   :  { %1106 = vmatprep.subr.bf16.mxu0 %v2772_v33  ;;  %1147 = vmatprep.subr.bf16.mxu1 %v2774_v34 }
 0x23b   :  { %v904_v14 = vpop.f32.mrf.mxu0  ;;  %v945_v20 = vpop.f32.mrf.mxu1 }
 0x23c   :  { %v952_v9 = vadd.f32 %v904_v14, %v2934_v25  ;;  %v954_v8 = vadd.f32 %v945_v20, %v2937_v26 }
 0x23d   :  { %v906_v13 = vpop.f32.mrf.mxu0  ;;  %v947_v18 = vpop.f32.mrf.mxu1 }
 0x23e   :  { %v2150_v24 = vmul.f32 -1.442695, %v952_v9  ;;  %v953_v12 = vadd.f32 %v906_v13, %v2940_v29  ;;  %v2152_v27 = vmul.f32 -1.442695, %v954_v8  ;;  %v955_v32 = vadd.f32 %v947_v18, %v2943_v30 }
 0x23f   :  { %v908_v28 = vpop.f32.mrf.mxu0  ;;  %v949_v51 = vpop.f32.mrf.mxu1 }
 0x240   :  { %2364 = vpow2.f32 %v2150_v24  ;;  %v2151_v11 = vmul.f32 -1.442695, %v953_v12 }
 0x241   :  { %v909_v17 = vpop.f32.mrf.mxu0  ;;  %v950_v22 = vpop.f32.mrf.mxu1 }
 0x242   :  { %2366 = vpow2.f32 %v2151_v11 }
 0x243   :  { %2368 = vpow2.f32 %v2152_v27 }
 0x244   :  { %2370 = vtanh.f32 %v955_v32 }
 0x24d   :  { %v2365_v15 = vpop.eup %2364 }
 0x24e   :  { %v965_v16 = vadd.f32 1.0, %v2365_v15 }
 0x24f   :  { %v2367_v25 = vpop.eup %2366 }
 0x250   :  { %2372 = vrcp.f32 %v965_v16  ;;  %v966_v0 = vadd.f32 1.0, %v2367_v25  ;;  %v2369_v29 = vpop.eup %2368 }
 0x251   :  { %v2371_v19 = vpop.eup %2370  ;;  %v967_v9 = vadd.f32 1.0, %v2369_v29 }
 0x252   :  { %2374 = vrcp.f32 %v966_v0 }
 0x253   :  { %2376 = vrcp.f32 %v967_v9 }
 0x25d   :  { %v2373_v21 = vpop.eup %2372 }
 0x25e   :  { %v976_v23 = vmul.f32 %v2373_v21, %v2371_v19 }
 0x25f   :  { %v2375_v14 = vpop.eup %2374 }
 0x260   :  { %v975_v13 = vmul.f32 %v2375_v14, %v3049_v31  ;;  %v2377_v30 = vpop.eup %2376 }
 0x262   :  { %v3091_v26 = vadd.f32 %v976_v23, %v975_v13 }
 0x264   :  { %2378 = vtanh.f32 %v3091_v26 }
 0x271   :  { %v2379_v20 = vpop.eup %2378 }
 0x272   :  { %v979_v18 = vmul.f32 %v2379_v20, %v2377_v30 }
 0x274   :  { %v987_v24 = vpack.c.bf16 %v979_v18, %v979_v18 }
 0x276   :  { %1021 = vmatmul.mubr.bf16.vlgmr.msra.gmra.mxu0 %v987_v24  ;;  %1062 = vmatmul.mubr.bf16.vlgmr.msra.gmra.mxu1 %v987_v24 }
 0x277   :  { %1107 = vmatpush1.bf16.msra.mxu0 %v2776_v36  ;;  %1148 = vmatpush1.bf16.msra.mxu1 %v2782_v38 }
 0x278   :  { %1108 = vmatprep.subr.bf16.mxu0 %v2779_v37  ;;  %1149 = vmatprep.subr.bf16.mxu1 %v2784_v39 }
 0x279   :  { %1138 = vmatprep.mubr.bf16.mxu0 %v3505_v60  ;;  %1179 = vmatprep.mubr.bf16.mxu1 %v3505_v60 }
 0x27b   :  { %1109 = vmatpush1.bf16.msra.mxu0 %v2787_v40  ;;  %1150 = vmatpush1.bf16.msra.mxu1 %v2795_v42 }
 0x27c   :  { %1110 = vmatprep.subr.bf16.mxu0 %v2792_v41  ;;  %1151 = vmatprep.subr.bf16.mxu1 %v2805_v46 }
 0x27f   :  { %1111 = vmatpush1.bf16.msra.mxu0 %v2799_v44  ;;  %1152 = vmatpush1.bf16.msra.mxu1 %v2807_v47 }
 0x280   :  { %1112 = vmatprep.subr.bf16.mxu0 %v2802_v45  ;;  %1153 = vmatprep.subr.bf16.mxu1 %v2813_v49 }
 0x283   :  { %1113 = vmatpush1.bf16.msra.mxu0 %v2811_v48  ;;  %1154 = vmatpush1.bf16.msra.mxu1 %v2825_v53 }
 0x284   :  { %1114 = vmatprep.subr.bf16.mxu0 %v2817_v50  ;;  %1155 = vmatprep.subr.bf16.mxu1 %v2828_v54 }
 0x287   :  { %1115 = vmatpush1.bf16.msra.mxu0 %v2823_v52  ;;  %1156 = vmatpush1.bf16.msra.mxu1 %v2834_v56 }
 0x288   :  { %1116 = vmatprep.subr.bf16.mxu0 %v2830_v55  ;;  %1157 = vmatprep.subr.bf16.mxu1 %v2840_v58 }
 0x28b   :  { %1117 = vmatpush1.bf16.msra.mxu0 %v2836_v57  ;;  %1158 = vmatpush1.bf16.msra.mxu1 %v2848_v61 }
 0x28c   :  { %1118 = vmatprep.subr.bf16.mxu0 %v2842_v59  ;;  %1159 = vmatprep.subr.bf16.mxu1 %v2854_v63 }
 0x28f   :  { %1119 = vmatpush1.bf16.msra.mxu0 %v2852_v62  ;;  %1160 = vmatpush1.bf16.msra.mxu1 %v2860_v2 }
 0x290   :  { %1120 = vmatprep.subr.bf16.mxu0 %v2856_v1  ;;  %1161 = vmatprep.subr.bf16.mxu1 %v2866_v4 }
 0x293   :  { %1121 = vmatpush1.bf16.msra.mxu0 %v2864_v3  ;;  %1162 = vmatpush1.bf16.msra.mxu1 %v2871_v6 }
 0x294   :  { %1224 = vmatprep.subr.bf16.mxu0 %v2772_v33  ;;  %1265 = vmatprep.subr.bf16.mxu1 %v2774_v34 }
 0x336   :  { %v1022_v31 = vpop.f32.mrf.mxu0  ;;  %v1063_v12 = vpop.f32.mrf.mxu1 }
 0x337   :  { %v1070_v28 = vadd.f32 %v1022_v31, %v2946_v35  ;;  %v1072_v25 = vadd.f32 %v1063_v12, %v2949_v43 }
 0x338   :  { %v1024_v51 = vpop.f32.mrf.mxu0  ;;  %v1065_v11 = vpop.f32.mrf.mxu1 }
 0x339   :  { %v2153_v17 = vmul.f32 -1.442695, %v1070_v28  ;;  %v1071_v22 = vadd.f32 %v1024_v51, %v2952_v5  ;;  %v2155_v0 = vmul.f32 -1.442695, %v1072_v25  ;;  %v1073_v29 = vadd.f32 %v1065_v11, %v2955_v7 }
 0x33a   :  { %v1026_v8 = vpop.f32.mrf.mxu0  ;;  %v1067_v27 = vpop.f32.mrf.mxu1 }
 0x33b   :  { %2380 = vpow2.f32 %v2153_v17  ;;  %v2154_v32 = vmul.f32 -1.442695, %v1071_v22  ;;  %v3506_v8 = vld [vmem:[#allocation23_spill] sm:$0xff] }
 0x33c   :  { %v1027_v15 = vpop.f32.mrf.mxu0  ;;  %v1068_v16 = vpop.f32.mrf.mxu1 }
 0x33d   :  { %2382 = vpow2.f32 %v2154_v32 }
 0x33e   :  { %2384 = vpow2.f32 %v2155_v0 }
 0x33f   :  { %2386 = vtanh.f32 %v1073_v29  ;;  %v3507_v29 = vld [vmem:[#allocation22_spill] sm:$0xff] }
 0x348   :  { %v2381_v19 = vpop.eup %2380 }
 0x349   :  { %v1083_v21 = vadd.f32 1.0, %v2381_v19 }
 0x34a   :  { %v2383_v35 = vpop.eup %2382 }
 0x34b   :  { %2388 = vrcp.f32 %v1083_v21  ;;  %v1084_v23 = vadd.f32 1.0, %v2383_v35  ;;  %v2385_v5 = vpop.eup %2384 }
 0x34c   :  { %v2387_v14 = vpop.eup %2386  ;;  %v1085_v20 = vadd.f32 1.0, %v2385_v5 }
 0x34d   :  { %2390 = vrcp.f32 %v1084_v23 }
 0x34e   :  { %2392 = vrcp.f32 %v1085_v20 }
 0x358   :  { %v2389_v9 = vpop.eup %2388 }
 0x359   :  { %v1094_v13 = vmul.f32 %v2389_v9, %v2387_v14 }
 0x35a   :  { %v2391_v30 = vpop.eup %2390 }
 0x35b   :  { %v1093_v18 = vmul.f32 %v2391_v30, %v3091_v26  ;;  %v2393_v7 = vpop.eup %2392 }
 0x35d   :  { %v3133_v43 = vadd.f32 %v1094_v13, %v1093_v18 }
 0x35f   :  { %2394 = vtanh.f32 %v3133_v43 }
 0x36c   :  { %v2395_v24 = vpop.eup %2394 }
 0x36d   :  { %v1097_v31 = vmul.f32 %v2395_v24, %v2393_v7 }
 0x36f   :  { %v1105_v12 = vpack.c.bf16 %v1097_v31, %v1097_v31 }
 0x371   :  { %1139 = vmatmul.mubr.bf16.vlgmr.msra.gmra.mxu0 %v1105_v12  ;;  %1180 = vmatmul.mubr.bf16.vlgmr.msra.gmra.mxu1 %v1105_v12 }
 0x372   :  { %1225 = vmatpush1.bf16.msra.mxu0 %v2776_v36  ;;  %1266 = vmatpush1.bf16.msra.mxu1 %v2782_v38 }
 0x373   :  { %1226 = vmatprep.subr.bf16.mxu0 %v2779_v37  ;;  %1267 = vmatprep.subr.bf16.mxu1 %v2784_v39 }
 0x374   :  { %1256 = vmatprep.mubr.bf16.mxu0 %v3505_v60  ;;  %1297 = vmatprep.mubr.bf16.mxu1 %v3505_v60 }
 0x376   :  { %1227 = vmatpush1.bf16.msra.mxu0 %v2787_v40  ;;  %1268 = vmatpush1.bf16.msra.mxu1 %v2795_v42 }
 0x377   :  { %1228 = vmatprep.subr.bf16.mxu0 %v2792_v41  ;;  %1269 = vmatprep.subr.bf16.mxu1 %v2805_v46 }
 0x37a   :  { %1229 = vmatpush1.bf16.msra.mxu0 %v2799_v44  ;;  %1270 = vmatpush1.bf16.msra.mxu1 %v2807_v47 }
 0x37b   :  { %1230 = vmatprep.subr.bf16.mxu0 %v2802_v45  ;;  %1271 = vmatprep.subr.bf16.mxu1 %v2813_v49 }
 0x37e   :  { %1231 = vmatpush1.bf16.msra.mxu0 %v2811_v48  ;;  %1272 = vmatpush1.bf16.msra.mxu1 %v2825_v53 }
 0x37f   :  { %1232 = vmatprep.subr.bf16.mxu0 %v2817_v50  ;;  %1273 = vmatprep.subr.bf16.mxu1 %v2828_v54 }
 0x382   :  { %1233 = vmatpush1.bf16.msra.mxu0 %v2823_v52  ;;  %1274 = vmatpush1.bf16.msra.mxu1 %v2834_v56 }
 0x383   :  { %1234 = vmatprep.subr.bf16.mxu0 %v2830_v55  ;;  %1275 = vmatprep.subr.bf16.mxu1 %v2840_v58 }
 0x386   :  { %1235 = vmatpush1.bf16.msra.mxu0 %v2836_v57  ;;  %1276 = vmatpush1.bf16.msra.mxu1 %v2848_v61 }
 0x387   :  { %1236 = vmatprep.subr.bf16.mxu0 %v2842_v59  ;;  %1277 = vmatprep.subr.bf16.mxu1 %v2854_v63 }
 0x38a   :  { %1237 = vmatpush1.bf16.msra.mxu0 %v2852_v62  ;;  %1278 = vmatpush1.bf16.msra.mxu1 %v2860_v2 }
 0x38b   :  { %1238 = vmatprep.subr.bf16.mxu0 %v2856_v1  ;;  %1279 = vmatprep.subr.bf16.mxu1 %v2866_v4 }
 0x38e   :  { %1239 = vmatpush1.bf16.msra.mxu0 %v2864_v3  ;;  %1280 = vmatpush1.bf16.msra.mxu1 %v2871_v6 }
 0x38f   :  { %1342 = vmatprep.subr.bf16.mxu0 %v2772_v33  ;;  %1383 = vmatprep.subr.bf16.mxu1 %v2774_v34  ;;  %v3508_v34 = vld [vmem:[#allocation24_spill] sm:$0xff] }
 0x431   :  { %v1140_v26 = vpop.f32.mrf.mxu0  ;;  %v1181_v28 = vpop.f32.mrf.mxu1 }
 0x432   :  { %v1188_v51 = vadd.f32 %v1140_v26, %v2958_v10  ;;  %v1190_v33 = vadd.f32 %v1181_v28, %v3507_v29  ;;  %v3238_v29 = vld [vmem:[#allocation10 + $0xc0] ss:$16 sps:$4 sm:$0xff]  }
 0x433   :  { %v1142_v11 = vpop.f32.mrf.mxu0  ;;  %v1183_v17 = vpop.f32.mrf.mxu1 }
 0x434   :  { %v2156_v22 = vmul.f32 -1.442695, %v1188_v51  ;;  %v1189_v27 = vadd.f32 %v1142_v11, %v3506_v8  ;;  %v2158_v19 = vmul.f32 -1.442695, %v1190_v33  ;;  %v1191_v21 = vadd.f32 %v1183_v17, %v3508_v34  ;;  %v3241_v33 = vld [vmem:[#allocation10 + $0xc8] ss:$16 sps:$4 sm:$0xff]  }
 0x435   :  { %v1144_v32 = vpop.f32.mrf.mxu0  ;;  %v1185_v15 = vpop.f32.mrf.mxu1  ;;  %v3247_v34 = vld [vmem:[#allocation10 + $0xac] ss:$16 sps:$4 sm:$0xff]  }
 0x436   :  { %2396 = vpow2.f32 %v2156_v22  ;;  %v2157_v16 = vmul.f32 -1.442695, %v1189_v27  ;;  %v3224_v15 = vld [vmem:[#allocation10 + $0xe0] ss:$16 sps:$4 sm:$0xff]  }
 0x437   :  { %v1145_v25 = vpop.f32.mrf.mxu0  ;;  %v1186_v0 = vpop.f32.mrf.mxu1 }
 0x438   :  { %2398 = vpow2.f32 %v2157_v16  ;;  %v3227_v16 = vld [vmem:[#allocation10 + $0xe8] ss:$16 sps:$4 sm:$0xff]   ;;  %v3230_v25 = vld [vmem:[#allocation10 + $0xc4] ss:$16 sps:$4 sm:$0xff]   ;;  %v3233_v0 = vld [vmem:[#allocation10 + $0xcc] ss:$16 sps:$4 sm:$0xff]  }
 0x439   :  { %2400 = vpow2.f32 %v2158_v19  ;;  %v3244_v19 = vld [vmem:[#allocation10 + $0xa4] ss:$16 sps:$4 sm:$0xff]  }
 0x43a   :  { %2402 = vtanh.f32 %v1191_v21  ;;  %v3250_v21 = vld [vmem:[#allocation10 + $0xa0] ss:$16 sps:$4 sm:$0xff]  }
 0x443   :  { %v2397_v35 = vpop.eup %2396 }
 0x444   :  { %v1201_v23 = vadd.f32 1.0, %v2397_v35  ;;  %v3253_v35 = vld [vmem:[#allocation10 + $0xa8] ss:$16 sps:$4 sm:$0xff]  }
 0x445   :  { %v2399_v10 = vpop.eup %2398 }
 0x446   :  { %2404 = vrcp.f32 %v1201_v23  ;;  %v1202_v5 = vadd.f32 1.0, %v2399_v10  ;;  %v2401_v14 = vpop.eup %2400  ;;  %v3256_v23 = vld [vmem:[#allocation10 + $0x84] ss:$16 sps:$4 sm:$0xff]   ;;  %v3259_v10 = vld [vmem:[#allocation10 + $0x8c] ss:$16 sps:$4 sm:$0xff]  }
 0x447   :  { %v2403_v9 = vpop.eup %2402  ;;  %v1203_v18 = vadd.f32 1.0, %v2401_v14  ;;  %v3265_v14 = vld [vmem:[#allocation10 + $0x88] ss:$16 sps:$4 sm:$0xff]  }
 0x448   :  { %2406 = vrcp.f32 %v1202_v5  ;;  %v3262_v5 = vld [vmem:[#allocation10 + $0x80] ss:$16 sps:$4 sm:$0xff]  }
 0x449   :  { %2408 = vrcp.f32 %v1203_v18  ;;  %v3280_v18 = vld [vmem:[#allocation10 + $0x44] ss:$16 sps:$4 sm:$0xff]  }
 0x453   :  { %v2405_v13 = vpop.eup %2404 }
 0x454   :  { %v1212_v30 = vmul.f32 %v2405_v13, %v2403_v9  ;;  %v3268_v9 = vld [vmem:[#allocation10 + $0x64] ss:$16 sps:$4 sm:$0xff]   ;;  %v3271_v13 = vld [vmem:[#allocation10 + $0x6c] ss:$16 sps:$4 sm:$0xff]  }
 0x455   :  { %v2407_v20 = vpop.eup %2406 }
 0x456   :  { %v1211_v7 = vmul.f32 %v2407_v20, %v3133_v43  ;;  %v2409_v31 = vpop.eup %2408  ;;  %v3277_v20 = vld [vmem:[#allocation10 + $0x68] ss:$16 sps:$4 sm:$0xff]  }
 0x458   :  { %v3175_v24 = vadd.f32 %v1212_v30, %v1211_v7  ;;  %v3274_v30 = vld [vmem:[#allocation10 + $0x60] ss:$16 sps:$4 sm:$0xff]   ;;  %v3283_v7 = vld [vmem:[#allocation10 + $0x4c] ss:$16 sps:$4 sm:$0xff]  }
 0x45a   :  { %2410 = vtanh.f32 %v3175_v24 }
 0x467   :  { %v2411_v12 = vpop.eup %2410 }
 0x468   :  { %v1215_v26 = vmul.f32 %v2411_v12, %v2409_v31  ;;  %v3289_v31 = vld [vmem:[#allocation10 + $0x48] ss:$16 sps:$4 sm:$0xff]   ;;  %v3292_v12 = vld [vmem:[#allocation10 + $0x24] ss:$16 sps:$4 sm:$0xff]  }
 0x46a   :  { %v1223_v28 = vpack.c.bf16 %v1215_v26, %v1215_v26  ;;  %v3295_v26 = vld [vmem:[#allocation10 + $0x2c] ss:$16 sps:$4 sm:$0xff]  }
 0x46c   :  { %1257 = vmatmul.mubr.bf16.vlgmr.msra.gmra.mxu0 %v1223_v28  ;;  %1298 = vmatmul.mubr.bf16.vlgmr.msra.gmra.mxu1 %v1223_v28  ;;  %v3298_v28 = vld [vmem:[#allocation10 + $0x20] ss:$16 sps:$4 sm:$0xff]  }
 0x46d   :  { %1343 = vmatpush1.bf16.msra.mxu0 %v2776_v36  ;;  %1384 = vmatpush1.bf16.msra.mxu1 %v2782_v38  ;;  %v3210_v36 = vld [vmem:[#allocation10 + $0xe4] ss:$16 sps:$4 sm:$0xff]  }
 0x46e   :  { %1344 = vmatprep.subr.bf16.mxu0 %v2779_v37  ;;  %1385 = vmatprep.subr.bf16.mxu1 %v2784_v39  ;;  %v3213_v37 = vld [vmem:[#allocation10 + $0xec] ss:$16 sps:$4 sm:$0xff]  }
 0x46f   :  { %1374 = vmatprep.mubr.bf16.mxu0 %v3505_v60  ;;  %1415 = vmatprep.mubr.bf16.mxu1 %v3505_v60 }
 0x471   :  { %1345 = vmatpush1.bf16.msra.mxu0 %v2787_v40  ;;  %1386 = vmatpush1.bf16.msra.mxu1 %v2795_v42  ;;  %v3509_v40 = vld [vmem:[#allocation25_spill] sm:$0xff] }
 0x472   :  { %1346 = vmatprep.subr.bf16.mxu0 %v2792_v41  ;;  %1387 = vmatprep.subr.bf16.mxu1 %v2805_v46  ;;  %v3510_v46 = vld [vmem:[#allocation27_spill] sm:$0xff] }
 0x475   :  { %1347 = vmatpush1.bf16.msra.mxu0 %v2799_v44  ;;  %1388 = vmatpush1.bf16.msra.mxu1 %v2807_v47 }
 0x476   :  { %1348 = vmatprep.subr.bf16.mxu0 %v2802_v45  ;;  %1389 = vmatprep.subr.bf16.mxu1 %v2813_v49 }
 0x479   :  { %1349 = vmatpush1.bf16.msra.mxu0 %v2811_v48  ;;  %1390 = vmatpush1.bf16.msra.mxu1 %v2825_v53 }
 0x47a   :  { %1350 = vmatprep.subr.bf16.mxu0 %v2817_v50  ;;  %1391 = vmatprep.subr.bf16.mxu1 %v2828_v54  ;;  %v3511_v54 = vld [vmem:[#allocation26_spill] sm:$0xff] }
 0x47d   :  { %1351 = vmatpush1.bf16.msra.mxu0 %v2823_v52  ;;  %1392 = vmatpush1.bf16.msra.mxu1 %v2834_v56 }
 0x47e   :  { %1352 = vmatprep.subr.bf16.mxu0 %v2830_v55  ;;  %1393 = vmatprep.subr.bf16.mxu1 %v2840_v58 }
 0x481   :  { %1353 = vmatpush1.bf16.msra.mxu0 %v2836_v57  ;;  %1394 = vmatpush1.bf16.msra.mxu1 %v2848_v61  ;;  %v3512_v57 = vld [vmem:[#allocation28_spill] sm:$0xff] }
 0x482   :  { %1354 = vmatprep.subr.bf16.mxu0 %v2842_v59  ;;  %1395 = vmatprep.subr.bf16.mxu1 %v2854_v63 }
 0x485   :  { %1355 = vmatpush1.bf16.msra.mxu0 %v2852_v62  ;;  %1396 = vmatpush1.bf16.msra.mxu1 %v2860_v2 }
 0x486   :  { %1356 = vmatprep.subr.bf16.mxu0 %v2856_v1  ;;  %1397 = vmatprep.subr.bf16.mxu1 %v2866_v4 }
 0x489   :  { %1357 = vmatpush1.bf16.msra.mxu0 %v2864_v3  ;;  %1398 = vmatpush1.bf16.msra.mxu1 %v2871_v6 }
 0x48a   :  { %1460 = vmatprep.subr.bf16.mxu0 %v3210_v36  ;;  %1501 = vmatprep.subr.bf16.mxu1 %v3213_v37 }
 0x52c   :  { %v1258_v38 = vpop.f32.mrf.mxu0  ;;  %v1299_v39 = vpop.f32.mrf.mxu1 }
 0x52d   :  { %v1306_v41 = vadd.f32 %v1258_v38, %v3509_v40  ;;  %v1308_v55 = vadd.f32 %v1299_v39, %v3511_v54  ;;  %v3301_v38 = vld [vmem:[#allocation10 + $0x28] ss:$16 sps:$4 sm:$0xff]   ;;  %v3304_v39 = vld [vmem:[#allocation10 + $0x4] ss:$16 sps:$4 sm:$0xff]   ;;  %v3307_v40 = vld [vmem:[#allocation10 + $0xc] ss:$16 sps:$4 sm:$0xff]  }
 0x52e   :  { %v1260_v42 = vpop.f32.mrf.mxu0  ;;  %v1301_v44 = vpop.f32.mrf.mxu1 }
 0x52f   :  { %v2159_v45 = vmul.f32 -1.442695, %v1306_v41  ;;  %v1307_v47 = vadd.f32 %v1260_v42, %v3510_v46  ;;  %v2161_v56 = vmul.f32 -1.442695, %v1308_v55  ;;  %v1309_v58 = vadd.f32 %v1301_v44, %v3512_v57  ;;  %v3310_v41 = vld [vmem:[#allocation10] ss:$16 sps:$4 sm:$0xff]  }
 0x530   :  { %v1262_v48 = vpop.f32.mrf.mxu0  ;;  %v1303_v49 = vpop.f32.mrf.mxu1 }
 0x531   :  { %2412 = vpow2.f32 %v2159_v45  ;;  %v2160_v50 = vmul.f32 -1.442695, %v1307_v47  ;;  %v3513_v45 = vld [vmem:[#allocation29_spill] sm:$0xff] }
 0x532   :  { %v1263_v52 = vpop.f32.mrf.mxu0  ;;  %v1304_v53 = vpop.f32.mrf.mxu1 }
 0x533   :  { %2414 = vpow2.f32 %v2160_v50  ;;  %v3514_v50 = vld [vmem:[#allocation31_spill] sm:$0xff] }
 0x534   :  { %2416 = vpow2.f32 %v2161_v56 }
 0x535   :  { %2418 = vtanh.f32 %v1309_v58 }
 0x53e   :  { %v2413_v59 = vpop.eup %2412 }
 0x53f   :  { %v1319_v61 = vadd.f32 1.0, %v2413_v59 }
 0x540   :  { %v2415_v62 = vpop.eup %2414 }
 0x541   :  { %2420 = vrcp.f32 %v1319_v61  ;;  %v1320_v63 = vadd.f32 1.0, %v2415_v62  ;;  %v2417_v1 = vpop.eup %2416  ;;  %v3516_v61 = vld [vmem:[#allocation32_spill] sm:$0xff] }
 0x542   :  { %v2419_v2 = vpop.eup %2418  ;;  %v1321_v51 = vadd.f32 1.0, %v2417_v1 }
 0x543   :  { %2422 = vrcp.f32 %v1320_v63 }
 0x544   :  { %2424 = vrcp.f32 %v1321_v51 }
 0x54e   :  { %v2421_v3 = vpop.eup %2420 }
 0x54f   :  { %v1330_v4 = vmul.f32 %v2421_v3, %v2419_v2 }
 0x550   :  { %v2423_v43 = vpop.eup %2422 }
 0x551   :  { %v1329_v11 = vmul.f32 %v2423_v43, %v3175_v24  ;;  %v2425_v22 = vpop.eup %2424  ;;  %v3286_v24 = vld [vmem:[#allocation10 + $0x40] ss:$16 sps:$4 sm:$0xff]  }
 0x553   :  { %v3221_v17 = vadd.f32 %v1330_v4, %v1329_v11 }
 0x555   :  { %2426 = vtanh.f32 %v3221_v17 }
 0x562   :  { %v2427_v8 = vpop.eup %2426 }
 0x563   :  { %v1333_v27 = vmul.f32 %v2427_v8, %v2425_v22 }
 0x565   :  { %v1341_v32 = vpack.c.bf16 %v1333_v27, %v1333_v27 }
 0x567   :  { %1375 = vmatmul.mubr.bf16.vlgmr.msra.gmra.mxu0 %v1341_v32  ;;  %1416 = vmatmul.mubr.bf16.vlgmr.msra.gmra.mxu1 %v1341_v32 }
 0x568   :  { %1461 = vmatpush1.bf16.msra.mxu0 %v3224_v15  ;;  %1502 = vmatpush1.bf16.msra.mxu1 %v3227_v16 }
 0x569   :  { %1462 = vmatprep.subr.bf16.mxu0 %v3230_v25  ;;  %1503 = vmatprep.subr.bf16.mxu1 %v3233_v0 }
 0x56a   :  { %1492 = vmatprep.mubr.bf16.mxu0 %v3505_v60  ;;  %1533 = vmatprep.mubr.bf16.mxu1 %v3505_v60 }
 0x56c   :  { %1463 = vmatpush1.bf16.msra.mxu0 %v3238_v29  ;;  %1504 = vmatpush1.bf16.msra.mxu1 %v3241_v33 }
 0x56d   :  { %1464 = vmatprep.subr.bf16.mxu0 %v3244_v19  ;;  %1505 = vmatprep.subr.bf16.mxu1 %v3247_v34 }
 0x570   :  { %1465 = vmatpush1.bf16.msra.mxu0 %v3250_v21  ;;  %1506 = vmatpush1.bf16.msra.mxu1 %v3253_v35 }
 0x571   :  { %1466 = vmatprep.subr.bf16.mxu0 %v3256_v23  ;;  %1507 = vmatprep.subr.bf16.mxu1 %v3259_v10 }
 0x574   :  { %1467 = vmatpush1.bf16.msra.mxu0 %v3262_v5  ;;  %1508 = vmatpush1.bf16.msra.mxu1 %v3265_v14 }
 0x575   :  { %1468 = vmatprep.subr.bf16.mxu0 %v3268_v9  ;;  %1509 = vmatprep.subr.bf16.mxu1 %v3271_v13 }
 0x578   :  { %1469 = vmatpush1.bf16.msra.mxu0 %v3274_v30  ;;  %1510 = vmatpush1.bf16.msra.mxu1 %v3277_v20 }
 0x579   :  { %1470 = vmatprep.subr.bf16.mxu0 %v3280_v18  ;;  %1511 = vmatprep.subr.bf16.mxu1 %v3283_v7 }
 0x57c   :  { %1471 = vmatpush1.bf16.msra.mxu0 %v3286_v24  ;;  %1512 = vmatpush1.bf16.msra.mxu1 %v3289_v31 }
 0x57d   :  { %1472 = vmatprep.subr.bf16.mxu0 %v3292_v12  ;;  %1513 = vmatprep.subr.bf16.mxu1 %v3295_v26 }
 0x580   :  { %1473 = vmatpush1.bf16.msra.mxu0 %v3298_v28  ;;  %1514 = vmatpush1.bf16.msra.mxu1 %v3301_v38 }
 0x581   :  { %1474 = vmatprep.subr.bf16.mxu0 %v3304_v39  ;;  %1515 = vmatprep.subr.bf16.mxu1 %v3307_v40 }
 0x584   :  { %1475 = vmatpush1.bf16.msra.mxu0 %v3310_v41  ;;  %1516 = vmatpush1.bf16.msra.mxu1 %v2871_v6  ;;  %v3515_v6 = vld [vmem:[#allocation30_spill] sm:$0xff] }
 0x585   :  { %1578 = vmatprep.subr.bf16.mxu0 %v3210_v36  ;;  %1619 = vmatprep.subr.bf16.mxu1 %v3213_v37 }
 0x627   :  { %v1376_v42 = vpop.f32.mrf.mxu0  ;;  %v1417_v44 = vpop.f32.mrf.mxu1 }
 0x628   :  { %v1424_v46 = vadd.f32 %v1376_v42, %v3513_v45  ;;  %v1426_v58 = vadd.f32 %v1417_v44, %v3515_v6 }
 0x629   :  { %v1378_v47 = vpop.f32.mrf.mxu0  ;;  %v1419_v48 = vpop.f32.mrf.mxu1 }
 0x62a   :  { %v2162_v49 = vmul.f32 -1.442695, %v1424_v46  ;;  %v1425_v52 = vadd.f32 %v1378_v47, %v3514_v50  ;;  %v2164_v59 = vmul.f32 -1.442695, %v1426_v58  ;;  %v1427_v62 = vadd.f32 %v1419_v48, %v3516_v61 }
 0x62b   :  { %v1380_v53 = vpop.f32.mrf.mxu0  ;;  %v1421_v54 = vpop.f32.mrf.mxu1 }
 0x62c   :  { %2428 = vpow2.f32 %v2162_v49  ;;  %v2163_v55 = vmul.f32 -1.442695, %v1425_v52  ;;  %v3517_v49 = vld [vmem:[#allocation33_spill] sm:$0xff] }
 0x62d   :  { %v1381_v56 = vpop.f32.mrf.mxu0  ;;  %v1422_v57 = vpop.f32.mrf.mxu1 }
 0x62e   :  { %2430 = vpow2.f32 %v2163_v55  ;;  %v3518_v55 = vld [vmem:[#allocation35_spill] sm:$0xff] }
 0x62f   :  { %2432 = vpow2.f32 %v2164_v59 }
 0x630   :  { %2434 = vtanh.f32 %v1427_v62  ;;  %v3519_v62 = vld [vmem:[#allocation34_spill] sm:$0xff] }
 0x639   :  { %v2429_v63 = vpop.eup %2428 }
 0x63a   :  { %v1437_v1 = vadd.f32 1.0, %v2429_v63 }
 0x63b   :  { %v2431_v2 = vpop.eup %2430 }
 0x63c   :  { %2436 = vrcp.f32 %v1437_v1  ;;  %v1438_v3 = vadd.f32 1.0, %v2431_v2  ;;  %v2433_v4 = vpop.eup %2432  ;;  %v3520_v2 = vld [vmem:[#allocation36_spill] sm:$0xff] }
 0x63d   :  { %v2435_v43 = vpop.eup %2434  ;;  %v1439_v8 = vadd.f32 1.0, %v2433_v4 }
 0x63e   :  { %2438 = vrcp.f32 %v1438_v3 }
 0x63f   :  { %2440 = vrcp.f32 %v1439_v8 }
 0x649   :  { %v2437_v51 = vpop.eup %2436 }
 0x64a   :  { %v1448_v11 = vmul.f32 %v2437_v51, %v2435_v43 }
 0x64b   :  { %v2439_v22 = vpop.eup %2438 }
 0x64c   :  { %v1447_v27 = vmul.f32 %v2439_v22, %v3221_v17  ;;  %v2441_v42 = vpop.eup %2440  ;;  %v3355_v17 = vld [vmem:[#allocation10 + $0x8] ss:$16 sps:$4 sm:$0xff]  }
 0x64e   :  { %v3321_v32 = vadd.f32 %v1448_v11, %v1447_v27 }
 0x650   :  { %2442 = vtanh.f32 %v3321_v32 }
 0x65d   :  { %v2443_v44 = vpop.eup %2442 }
 0x65e   :  { %v1451_v45 = vmul.f32 %v2443_v44, %v2441_v42 }
 0x660   :  { %v1459_v46 = vpack.c.bf16 %v1451_v45, %v1451_v45 }
 0x662   :  { %1493 = vmatmul.mubr.bf16.vlgmr.msra.gmra.mxu0 %v1459_v46  ;;  %1534 = vmatmul.mubr.bf16.vlgmr.msra.gmra.mxu1 %v1459_v46 }
 0x663   :  { %1579 = vmatpush1.bf16.msra.mxu0 %v3224_v15  ;;  %1620 = vmatpush1.bf16.msra.mxu1 %v3227_v16 }
 0x664   :  { %1580 = vmatprep.subr.bf16.mxu0 %v3230_v25  ;;  %1621 = vmatprep.subr.bf16.mxu1 %v3233_v0 }
 0x665   :  { %1610 = vmatprep.mubr.bf16.mxu0 %v3505_v60  ;;  %1651 = vmatprep.mubr.bf16.mxu1 %v3505_v60 }
 0x667   :  { %1581 = vmatpush1.bf16.msra.mxu0 %v3238_v29  ;;  %1622 = vmatpush1.bf16.msra.mxu1 %v3241_v33 }
 0x668   :  { %1582 = vmatprep.subr.bf16.mxu0 %v3244_v19  ;;  %1623 = vmatprep.subr.bf16.mxu1 %v3247_v34 }
 0x66b   :  { %1583 = vmatpush1.bf16.msra.mxu0 %v3250_v21  ;;  %1624 = vmatpush1.bf16.msra.mxu1 %v3253_v35 }
 0x66c   :  { %1584 = vmatprep.subr.bf16.mxu0 %v3256_v23  ;;  %1625 = vmatprep.subr.bf16.mxu1 %v3259_v10 }
 0x66f   :  { %1585 = vmatpush1.bf16.msra.mxu0 %v3262_v5  ;;  %1626 = vmatpush1.bf16.msra.mxu1 %v3265_v14 }
 0x670   :  { %1586 = vmatprep.subr.bf16.mxu0 %v3268_v9  ;;  %1627 = vmatprep.subr.bf16.mxu1 %v3271_v13 }
 0x673   :  { %1587 = vmatpush1.bf16.msra.mxu0 %v3274_v30  ;;  %1628 = vmatpush1.bf16.msra.mxu1 %v3277_v20 }
 0x674   :  { %1588 = vmatprep.subr.bf16.mxu0 %v3280_v18  ;;  %1629 = vmatprep.subr.bf16.mxu1 %v3283_v7 }
 0x677   :  { %1589 = vmatpush1.bf16.msra.mxu0 %v3286_v24  ;;  %1630 = vmatpush1.bf16.msra.mxu1 %v3289_v31 }
 0x678   :  { %1590 = vmatprep.subr.bf16.mxu0 %v3292_v12  ;;  %1631 = vmatprep.subr.bf16.mxu1 %v3295_v26 }
 0x67b   :  { %1591 = vmatpush1.bf16.msra.mxu0 %v3298_v28  ;;  %1632 = vmatpush1.bf16.msra.mxu1 %v3301_v38 }
 0x67c   :  { %1592 = vmatprep.subr.bf16.mxu0 %v3304_v39  ;;  %1633 = vmatprep.subr.bf16.mxu1 %v3307_v40 }
 0x67f   :  { %1593 = vmatpush1.bf16.msra.mxu0 %v3310_v41  ;;  %1634 = vmatpush1.bf16.msra.mxu1 %v3355_v17 }
 0x680   :  { %1696 = vmatprep.subr.bf16.mxu0 %v3210_v36  ;;  %1737 = vmatprep.subr.bf16.mxu1 %v3213_v37 }
 0x722   :  { %v1494_v47 = vpop.f32.mrf.mxu0  ;;  %v1535_v48 = vpop.f32.mrf.mxu1 }
 0x723   :  { %v1542_v50 = vadd.f32 %v1494_v47, %v3517_v49  ;;  %v1544_v63 = vadd.f32 %v1535_v48, %v3519_v62 }
 0x724   :  { %v1496_v52 = vpop.f32.mrf.mxu0  ;;  %v1537_v53 = vpop.f32.mrf.mxu1 }
 0x725   :  { %v2165_v54 = vmul.f32 -1.442695, %v1542_v50  ;;  %v1543_v56 = vadd.f32 %v1496_v52, %v3518_v55  ;;  %v2167_v1 = vmul.f32 -1.442695, %v1544_v63  ;;  %v1545_v3 = vadd.f32 %v1537_v53, %v3520_v2 }
 0x726   :  { %v1498_v57 = vpop.f32.mrf.mxu0  ;;  %v1539_v6 = vpop.f32.mrf.mxu1 }
 0x727   :  { %2444 = vpow2.f32 %v2165_v54  ;;  %v2166_v58 = vmul.f32 -1.442695, %v1543_v56  ;;  %v3521_v54 = vld [vmem:[#allocation37_spill] sm:$0xff] }
 0x728   :  { %v1499_v59 = vpop.f32.mrf.mxu0  ;;  %v1540_v61 = vpop.f32.mrf.mxu1 }
 0x729   :  { %2446 = vpow2.f32 %v2166_v58  ;;  %v3522_v58 = vld [vmem:[#allocation39_spill] sm:$0xff] }
 0x72a   :  { %2448 = vpow2.f32 %v2167_v1 }
 0x72b   :  { %2450 = vtanh.f32 %v1545_v3  ;;  %v3523_v3 = vld [vmem:[#allocation38_spill] sm:$0xff] }
 0x734   :  { %v2445_v4 = vpop.eup %2444 }
 0x735   :  { %v1555_v43 = vadd.f32 1.0, %v2445_v4 }
 0x736   :  { %v2447_v51 = vpop.eup %2446 }
 0x737   :  { %2452 = vrcp.f32 %v1555_v43  ;;  %v1556_v11 = vadd.f32 1.0, %v2447_v51  ;;  %v2449_v22 = vpop.eup %2448 }
 0x738   :  { %v2451_v8 = vpop.eup %2450  ;;  %v1557_v45 = vadd.f32 1.0, %v2449_v22 }
 0x739   :  { %2454 = vrcp.f32 %v1556_v11 }
 0x73a   :  { %2456 = vrcp.f32 %v1557_v45 }
 0x744   :  { %v2453_v27 = vpop.eup %2452 }
 0x745   :  { %v1566_v42 = vmul.f32 %v2453_v27, %v2451_v8 }
 0x746   :  { %v2455_v44 = vpop.eup %2454 }
 0x747   :  { %v1565_v46 = vmul.f32 %v2455_v44, %v3321_v32  ;;  %v2457_v48 = vpop.eup %2456 }
 0x749   :  { %v3365_v47 = vadd.f32 %v1566_v42, %v1565_v46 }
 0x74b   :  { %2458 = vtanh.f32 %v3365_v47 }
 0x758   :  { %v2459_v49 = vpop.eup %2458 }
 0x759   :  { %v1569_v50 = vmul.f32 %v2459_v49, %v2457_v48 }
 0x75b   :  { %v1577_v52 = vpack.c.bf16 %v1569_v50, %v1569_v50 }
 0x75d   :  { %1611 = vmatmul.mubr.bf16.vlgmr.msra.gmra.mxu0 %v1577_v52  ;;  %1652 = vmatmul.mubr.bf16.vlgmr.msra.gmra.mxu1 %v1577_v52 }
 0x75e   :  { %1697 = vmatpush1.bf16.msra.mxu0 %v3224_v15  ;;  %1738 = vmatpush1.bf16.msra.mxu1 %v3227_v16 }
 0x75f   :  { %1698 = vmatprep.subr.bf16.mxu0 %v3230_v25  ;;  %1739 = vmatprep.subr.bf16.mxu1 %v3233_v0 }
 0x760   :  { %1728 = vmatprep.mubr.bf16.mxu0 %v3505_v60  ;;  %1769 = vmatprep.mubr.bf16.mxu1 %v3505_v60 }
 0x762   :  { %1699 = vmatpush1.bf16.msra.mxu0 %v3238_v29  ;;  %1740 = vmatpush1.bf16.msra.mxu1 %v3241_v33 }
 0x763   :  { %1700 = vmatprep.subr.bf16.mxu0 %v3244_v19  ;;  %1741 = vmatprep.subr.bf16.mxu1 %v3247_v34 }
 0x766   :  { %1701 = vmatpush1.bf16.msra.mxu0 %v3250_v21  ;;  %1742 = vmatpush1.bf16.msra.mxu1 %v3253_v35 }
 0x767   :  { %1702 = vmatprep.subr.bf16.mxu0 %v3256_v23  ;;  %1743 = vmatprep.subr.bf16.mxu1 %v3259_v10 }
 0x76a   :  { %1703 = vmatpush1.bf16.msra.mxu0 %v3262_v5  ;;  %1744 = vmatpush1.bf16.msra.mxu1 %v3265_v14 }
 0x76b   :  { %1704 = vmatprep.subr.bf16.mxu0 %v3268_v9  ;;  %1745 = vmatprep.subr.bf16.mxu1 %v3271_v13 }
 0x76e   :  { %1705 = vmatpush1.bf16.msra.mxu0 %v3274_v30  ;;  %1746 = vmatpush1.bf16.msra.mxu1 %v3277_v20 }
 0x76f   :  { %1706 = vmatprep.subr.bf16.mxu0 %v3280_v18  ;;  %1747 = vmatprep.subr.bf16.mxu1 %v3283_v7 }
 0x772   :  { %1707 = vmatpush1.bf16.msra.mxu0 %v3286_v24  ;;  %1748 = vmatpush1.bf16.msra.mxu1 %v3289_v31 }
 0x773   :  { %1708 = vmatprep.subr.bf16.mxu0 %v3292_v12  ;;  %1749 = vmatprep.subr.bf16.mxu1 %v3295_v26 }
 0x776   :  { %1709 = vmatpush1.bf16.msra.mxu0 %v3298_v28  ;;  %1750 = vmatpush1.bf16.msra.mxu1 %v3301_v38 }
 0x777   :  { %1710 = vmatprep.subr.bf16.mxu0 %v3304_v39  ;;  %1751 = vmatprep.subr.bf16.mxu1 %v3307_v40 }
 0x77a   :  { %1711 = vmatpush1.bf16.msra.mxu0 %v3310_v41  ;;  %1752 = vmatpush1.bf16.msra.mxu1 %v3355_v17 }
 0x77b   :  { %1814 = vmatprep.subr.bf16.mxu0 %v3210_v36  ;;  %1855 = vmatprep.subr.bf16.mxu1 %v3213_v37  ;;  %v3524_v37 = vld [vmem:[#allocation40_spill] sm:$0xff] }
 0x81d   :  { %v1612_v32 = vpop.f32.mrf.mxu0  ;;  %v1653_v53 = vpop.f32.mrf.mxu1 }
 0x81e   :  { %v1660_v55 = vadd.f32 %v1612_v32, %v3521_v54  ;;  %v1662_v36 = vadd.f32 %v1653_v53, %v3523_v3  ;;  %v1939_v3 = vld [vmem:[#allocation11 + $0x40] sm:$0xff] }
 0x81f   :  { %v1614_v56 = vpop.f32.mrf.mxu0  ;;  %v1655_v57 = vpop.f32.mrf.mxu1 }
 0x820   :  { %v2168_v6 = vmul.f32 -1.442695, %v1660_v55  ;;  %v1661_v59 = vadd.f32 %v1614_v56, %v3522_v58  ;;  %v2170_v4 = vmul.f32 -1.442695, %v1662_v36  ;;  %v1663_v43 = vadd.f32 %v1655_v57, %v3524_v37  ;;  %v1946_v58 = vld [vmem:[#allocation11 + $0x78] sm:$0xff]  ;;  %v1936_v37 = vld [vmem:[#allocation11 + $0x28] sm:$0xff] }
 0x821   :  { %v1616_v61 = vpop.f32.mrf.mxu0  ;;  %v1657_v62 = vpop.f32.mrf.mxu1  ;;  %v1938_v36 = vld [vmem:[#allocation11 + $0x38] sm:$0xff] }
 0x822   :  { %2460 = vpow2.f32 %v2168_v6  ;;  %v2169_v63 = vmul.f32 -1.442695, %v1661_v59  ;;  %v2702_v6 = vmov 0.0   ;;  %v1945_v59 = vld [vmem:[#allocation11 + $0x70] sm:$0xff]  ;;  %v1944_v61 = vld [vmem:[#allocation11 + $0x68] sm:$0xff]  ;;  %v1943_v62 = vld [vmem:[#allocation11 + $0x60] sm:$0xff] }
 0x823   :  { %v1617_v1 = vpop.f32.mrf.mxu0  ;;  %v1658_v2 = vpop.f32.mrf.mxu1 }
 0x824   :  { %2462 = vpow2.f32 %v2169_v63  ;;  %v1942_v63 = vld [vmem:[#allocation11 + $0x58] sm:$0xff]  ;;  %v1941_v1 = vld [vmem:[#allocation11 + $0x50] sm:$0xff]  ;;  %v1940_v2 = vld [vmem:[#allocation11 + $0x48] sm:$0xff] }
 0x825   :  { %2464 = vpow2.f32 %v2170_v4  ;;  %v1937_v4 = vld [vmem:[#allocation11 + $0x30] sm:$0xff] }
 0x826   :  { %2466 = vtanh.f32 %v1663_v43  ;;  %v1935_v43 = vld [vmem:[#allocation11 + $0x20] sm:$0xff] }
 0x82f   :  { %v2461_v51 = vpop.eup %2460 }
 0x830   :  { %v1673_v11 = vadd.f32 1.0, %v2461_v51  ;;  %v1934_v51 = vld [vmem:[#allocation11 + $0x18] sm:$0xff] }
 0x831   :  { %v2463_v22 = vpop.eup %2462 }
 0x832   :  { %2468 = vrcp.f32 %v1673_v11  ;;  %v1674_v8 = vadd.f32 1.0, %v2463_v22  ;;  %v2465_v27 = vpop.eup %2464  ;;  %v1933_v11 = vld [vmem:[#allocation11 + $0x10] sm:$0xff]  ;;  %v1932_v22 = vld [vmem:[#allocation11 + $0x8] sm:$0xff] }
 0x833   :  { %v2467_v42 = vpop.eup %2466  ;;  %v1675_v48 = vadd.f32 1.0, %v2465_v27 }
 0x834   :  { %2470 = vrcp.f32 %v1674_v8  ;;  %v1931_v8 = vld [vmem:[#allocation11] sm:$0xff] }
 0x835   :  { %2472 = vrcp.f32 %v1675_v48 }
 0x83f   :  { %v2469_v44 = vpop.eup %2468 }
 0x840   :  { %v1684_v45 = vmul.f32 %v2469_v44, %v2467_v42  ;;  %v3529_v44 = vld [vmem:[#allocation45_spill] sm:$0xff] }
 0x841   :  { %v2471_v46 = vpop.eup %2470 }
 0x842   :  { %v1683_v49 = vmul.f32 %v2471_v46, %v3365_v47  ;;  %v2473_v52 = vpop.eup %2472 }
 0x844   :  { %v3407_v50 = vadd.f32 %v1684_v45, %v1683_v49 }
 0x846   :  { %2474 = vtanh.f32 %v3407_v50 }
 0x853   :  { %v2475_v32 = vpop.eup %2474 }
 0x854   :  { %v1687_v53 = vmul.f32 %v2475_v32, %v2473_v52 }
 0x856   :  { %v1695_v54 = vpack.c.bf16 %v1687_v53, %v1687_v53 }
 0x858   :  { %1729 = vmatmul.mubr.bf16.vlgmr.msra.gmra.mxu0 %v1695_v54  ;;  %1770 = vmatmul.mubr.bf16.vlgmr.msra.gmra.mxu1 %v1695_v54 }
 0x859   :  { %1815 = vmatpush1.bf16.msra.mxu0 %v3224_v15  ;;  %1856 = vmatpush1.bf16.msra.mxu1 %v3227_v16  ;;  %v3525_v16 = vld [vmem:[#allocation41_spill] sm:$0xff] }
 0x85a   :  { %1816 = vmatprep.subr.bf16.mxu0 %v3230_v25  ;;  %1857 = vmatprep.subr.bf16.mxu1 %v3233_v0 }
 0x85b   :  { %1846 = vmatprep.mubr.bf16.mxu0 %v3505_v60  ;;  %1887 = vmatprep.mubr.bf16.mxu1 %v3505_v60 }
 0x85d   :  { %1817 = vmatpush1.bf16.msra.mxu0 %v3238_v29  ;;  %1858 = vmatpush1.bf16.msra.mxu1 %v3241_v33 }
 0x85e   :  { %1818 = vmatprep.subr.bf16.mxu0 %v3244_v19  ;;  %1859 = vmatprep.subr.bf16.mxu1 %v3247_v34  ;;  %v3526_v19 = vld [vmem:[#allocation43_spill] sm:$0xff] }
 0x861   :  { %1819 = vmatpush1.bf16.msra.mxu0 %v3250_v21  ;;  %1860 = vmatpush1.bf16.msra.mxu1 %v3253_v35 }
 0x862   :  { %1820 = vmatprep.subr.bf16.mxu0 %v3256_v23  ;;  %1861 = vmatprep.subr.bf16.mxu1 %v3259_v10 }
 0x865   :  { %1821 = vmatpush1.bf16.msra.mxu0 %v3262_v5  ;;  %1862 = vmatpush1.bf16.msra.mxu1 %v3265_v14  ;;  %v3527_v14 = vld [vmem:[#allocation42_spill] sm:$0xff] }
 0x866   :  { %1822 = vmatprep.subr.bf16.mxu0 %v3268_v9  ;;  %1863 = vmatprep.subr.bf16.mxu1 %v3271_v13 }
 0x869   :  { %1823 = vmatpush1.bf16.msra.mxu0 %v3274_v30  ;;  %1864 = vmatpush1.bf16.msra.mxu1 %v3277_v20  ;;  %v3528_v30 = vld [vmem:[#allocation44_spill] sm:$0xff] }
 0x86a   :  { %1824 = vmatprep.subr.bf16.mxu0 %v3280_v18  ;;  %1865 = vmatprep.subr.bf16.mxu1 %v3283_v7 }
 0x86d   :  { %1825 = vmatpush1.bf16.msra.mxu0 %v3286_v24  ;;  %1866 = vmatpush1.bf16.msra.mxu1 %v3289_v31 }
 0x86e   :  { %1826 = vmatprep.subr.bf16.mxu0 %v3292_v12  ;;  %1867 = vmatprep.subr.bf16.mxu1 %v3295_v26 }
 0x871   :  { %1827 = vmatpush1.bf16.msra.mxu0 %v3298_v28  ;;  %1868 = vmatpush1.bf16.msra.mxu1 %v3301_v38 }
 0x872   :  { %1828 = vmatprep.subr.bf16.mxu0 %v3304_v39  ;;  %1869 = vmatprep.subr.bf16.mxu1 %v3307_v40 }
 0x875   :  { %1829 = vmatpush1.bf16.msra.mxu0 %v3310_v41  ;;  %1870 = vmatpush1.bf16.msra.mxu1 %v3355_v17 }
 0x876   :  { %2195 = vmatprep.subr.mxu0 %v2702_v6 }
 0x918   :  { %v1730_v60 = vpop.f32.mrf.mxu0  ;;  %v1771_v15 = vpop.f32.mrf.mxu1 }
 0x919   :  { %v1778_v25 = vadd.f32 %v1730_v60, %v3525_v16  ;;  %v1780_v9 = vadd.f32 %v1771_v15, %v3527_v14  ;;  %v3531_v16 = vld [vmem:[#allocation46_spill] sm:$0xff] }
 0x91a   :  { %v1732_v0 = vpop.f32.mrf.mxu0  ;;  %v1773_v29 = vpop.f32.mrf.mxu1 }
 0x91b   :  { %v2171_v33 = vmul.f32 -1.442695, %v1778_v25  ;;  %v1779_v34 = vadd.f32 %v1732_v0, %v3526_v19  ;;  %v2173_v13 = vmul.f32 -1.442695, %v1780_v9  ;;  %v1781_v20 = vadd.f32 %v1773_v29, %v3528_v30  ;;  %v3532_v29 = vld [vmem:[#allocation48_spill] sm:$0xff] }
 0x91c   :  { %v1734_v21 = vpop.f32.mrf.mxu0  ;;  %v1775_v35 = vpop.f32.mrf.mxu1 }
 0x91d   :  { %2476 = vpow2.f32 %v2171_v33  ;;  %v2172_v23 = vmul.f32 -1.442695, %v1779_v34 }
 0x91e   :  { %v1735_v10 = vpop.f32.mrf.mxu0  ;;  %v1776_v5 = vpop.f32.mrf.mxu1 }
 0x91f   :  { %2478 = vpow2.f32 %v2172_v23 }
 0x920   :  { %2480 = vpow2.f32 %v2173_v13 }
 0x921   :  { %2482 = vtanh.f32 %v1781_v20 }
 0x92a   :  { %v2477_v18 = vpop.eup %2476 }
 0x92b   :  { %v1791_v7 = vadd.f32 1.0, %v2477_v18 }
 0x92c   :  { %v2479_v24 = vpop.eup %2478 }
 0x92d   :  { %2484 = vrcp.f32 %v1791_v7  ;;  %v1792_v31 = vadd.f32 1.0, %v2479_v24  ;;  %v2481_v12 = vpop.eup %2480 }
 0x92e   :  { %v2483_v26 = vpop.eup %2482  ;;  %v1793_v40 = vadd.f32 1.0, %v2481_v12 }
 0x92f   :  { %2486 = vrcp.f32 %v1792_v31 }
 0x930   :  { %2488 = vrcp.f32 %v1793_v40 }
 0x93a   :  { %v2485_v28 = vpop.eup %2484 }
 0x93b   :  { %v1802_v38 = vmul.f32 %v2485_v28, %v2483_v26 }
 0x93c   :  { %v2487_v39 = vpop.eup %2486 }
 0x93d   :  { %v1801_v41 = vmul.f32 %v2487_v39, %v3407_v50  ;;  %v2489_v47 = vpop.eup %2488  ;;  %v3530_v50 = vld [vmem:[#allocation47_spill] sm:$0xff] }
 0x93f   :  { %v3447_v17 = vadd.f32 %v1802_v38, %v1801_v41 }
 0x941   :  { %2490 = vtanh.f32 %v3447_v17 }
 0x94e   :  { %v2491_v55 = vpop.eup %2490 }
 0x94f   :  { %v1805_v56 = vmul.f32 %v2491_v55, %v2489_v47 }
 0x951   :  { %v1813_v57 = vpack.c.bf16 %v1805_v56, %v1805_v56 }
 0x953   :  { %1847 = vmatmul.mubr.bf16.vlgmr.msra.gmra.mxu0 %v1813_v57  ;;  %1888 = vmatmul.mubr.bf16.vlgmr.msra.gmra.mxu1 %v1813_v57 }
 0x954   :  { %2196 = vmatpush3.msra.mxu0 %v1946_v58  ;;  %2227 = vmatprep.mubr.msk.f32.mxu0 %vm2703_vm0, %v2702_v6 }
 0x955   :  { %2197 = vmatprep.subr.mxu0 %v2702_v6 }
 0x956   :  { %2198 = vmatpush3.msra.mxu0 %v1945_v59 }
 0x957   :  { %2199 = vmatprep.subr.mxu0 %v2702_v6 }
 0x958   :  { %2200 = vmatpush3.msra.mxu0 %v1944_v61 }
 0x959   :  { %2201 = vmatprep.subr.mxu0 %v2702_v6 }
 0x95a   :  { %2202 = vmatpush3.msra.mxu0 %v1943_v62 }
 0x95b   :  { %2203 = vmatprep.subr.mxu0 %v2702_v6 }
 0x95c   :  { %2204 = vmatpush3.msra.mxu0 %v1942_v63 }
 0x95d   :  { %2205 = vmatprep.subr.mxu0 %v2702_v6 }
 0x95e   :  { %2206 = vmatpush3.msra.mxu0 %v1941_v1 }
 0x95f   :  { %2207 = vmatprep.subr.mxu0 %v2702_v6 }
 0x960   :  { %2208 = vmatpush3.msra.mxu0 %v1940_v2 }
 0x961   :  { %2209 = vmatprep.subr.mxu0 %v2702_v6 }
 0x962   :  { %2210 = vmatpush3.msra.mxu0 %v1939_v3 }
 0x963   :  { %2211 = vmatprep.subr.mxu0 %v2702_v6 }
 0x964   :  { %2212 = vmatpush3.msra.mxu0 %v1938_v36 }
 0x965   :  { %2213 = vmatprep.subr.mxu0 %v2702_v6 }
 0x966   :  { %2214 = vmatpush3.msra.mxu0 %v1937_v4 }
 0x967   :  { %2215 = vmatprep.subr.mxu0 %v2702_v6 }
 0x968   :  { %2216 = vmatpush3.msra.mxu0 %v1936_v37 }
 0x969   :  { %2217 = vmatprep.subr.mxu0 %v2702_v6 }
 0x96a   :  { %2218 = vmatpush3.msra.mxu0 %v1935_v43 }
 0x96b   :  { %2219 = vmatprep.subr.mxu0 %v2702_v6 }
 0x96c   :  { %2220 = vmatpush3.msra.mxu0 %v1934_v51 }
 0x96d   :  { %2221 = vmatprep.subr.mxu0 %v2702_v6 }
 0x96e   :  { %2222 = vmatpush3.msra.mxu0 %v1933_v11 }
 0x96f   :  { %2223 = vmatprep.subr.mxu0 %v2702_v6 }
 0x970   :  { %2224 = vmatpush3.msra.mxu0 %v1932_v22 }
 0x971   :  { %2225 = vmatprep.subr.mxu0 %v2702_v6 }
 0x972   :  { %2226 = vmatpush3.msra.mxu0 %v1931_v8 }
 0xa13   :  { %v1848_v27 = vpop.f32.mrf.mxu0  ;;  %v1889_v42 = vpop.f32.mrf.mxu1 }
 0xa14   :  { %v1896_v45 = vadd.f32 %v1848_v27, %v3529_v44  ;;  %v1898_v25 = vadd.f32 %v1889_v42, %v3531_v16 }
 0xa15   :  { %v1850_v46 = vpop.f32.mrf.mxu0  ;;  %v1891_v48 = vpop.f32.mrf.mxu1 }
 0xa16   :  { %v2174_v49 = vmul.f32 -1.442695, %v1896_v45  ;;  %v1897_v52 = vadd.f32 %v1850_v46, %v3530_v50  ;;  %v2176_v0 = vmul.f32 -1.442695, %v1898_v25  ;;  %v1899_v33 = vadd.f32 %v1891_v48, %v3532_v29 }
 0xa17   :  { %v1852_v32 = vpop.f32.mrf.mxu0  ;;  %v1893_v53 = vpop.f32.mrf.mxu1 }
 0xa18   :  { %2492 = vpow2.f32 %v2174_v49  ;;  %v2175_v54 = vmul.f32 -1.442695, %v1897_v52 }
 0xa19   :  { %v1853_v60 = vpop.f32.mrf.mxu0  ;;  %v1894_v15 = vpop.f32.mrf.mxu1 }
 0xa1a   :  { %2494 = vpow2.f32 %v2175_v54 }
 0xa1b   :  { %2496 = vpow2.f32 %v2176_v0 }
 0xa1c   :  { %2498 = vtanh.f32 %v1899_v33 }
 0xa25   :  { %v2493_v19 = vpop.eup %2492 }
 0xa26   :  { %v1909_v34 = vadd.f32 1.0, %v2493_v19 }
 0xa27   :  { %v2495_v21 = vpop.eup %2494 }
 0xa28   :  { %2500 = vrcp.f32 %v1909_v34  ;;  %v1910_v35 = vadd.f32 1.0, %v2495_v21  ;;  %v2497_v23 = vpop.eup %2496 }
 0xa29   :  { %v2499_v10 = vpop.eup %2498  ;;  %v1911_v13 = vadd.f32 1.0, %v2497_v23 }
 0xa2a   :  { %2502 = vrcp.f32 %v1910_v35 }
 0xa2b   :  { %2504 = vrcp.f32 %v1911_v13 }
 0xa35   :  { %v2501_v5 = vpop.eup %2500 }
 0xa36   :  { %v1920_v14 = vmul.f32 %v2501_v5, %v2499_v10 }
 0xa37   :  { %v2503_v9 = vpop.eup %2502 }
 0xa38   :  { %v1919_v30 = vmul.f32 %v2503_v9, %v3447_v17  ;;  %v2505_v18 = vpop.eup %2504 }
 0xa3a   :  { %v1921_v20 = vadd.f32 %v1920_v14, %v1919_v30 }
 0xa3c   :  { %2506 = vtanh.f32 %v1921_v20  ;;  %1930 = vst [vmem:[#allocation16] sm:$0xff] %v1921_v20 }
 0xa49   :  { %v2507_v7 = vpop.eup %2506 }
 0xa4a   :  { %v1923_v24 = vmul.f32 %v2507_v7, %v2505_v18 }
 0xa4c   :  { %2228 = vmatmul.mubr.f32.vlgmr.msra.gmra.mxu0 %v1923_v24  ;;  %1929 = vst [vmem:[#allocation14] sm:$0xff] %v1923_v24 }
 0xa4d   :  { %2631 = shalt.err (!%p2628_p10)
}
 0xa4e   :  { %2044 = dma.vmem_to_hbm [thread:$0]  %s2042_s29, 128, %s3474_s7, [#allocation15]  }
 0xa4f   :  { %s2705_s11 = smov [#allocation16]  }
 0xa50   :  { %s2051_s12 = sshll.u32 %s2705_s11, 4  ;;  %s2052_s12 = int_to_ptr.vmem [resolvable:$true] %s2051_s12 }
 0xa51   :  { %s2640_s13 = scalar_lea.vmem %s2052_s12, 128  ;;  %p2645_p12 = scmp.lt.s32.totalorder %s2052_s12, %s2052_s12 }
 0xa52   :  { %p2641_p11 = scmp.ne.s32.totalorder %s2052_s12, %s2640_s13  ;;  %p2646_p13 = scmp.lt.s32.totalorder %s2640_s13, %s2640_s13 }
 0xa54   :  { %p2647_p0 = por %p2646_p13, %p2645_p12 }
 0xa56   :  { %p2648_p1 = pnand %p2647_p0, %p2641_p11 }
 0xa58   :  { %2651 = shalt.err (!%p2648_p1)
}
 0xa59   :  { %2054 = dma.vmem_to_hbm [thread:$0]  %s2052_s12, 128, %s3475_s8, [#allocation15]   ;;  %v2177_v31 = vld [vmem:[%s3472_s5] ss:$0 sm:$0xff] }
 0xa5a   :  { %s2706_s18 = smov [#allocation13]  }
 0xa5b   :  { %s2031_s7 = sshll.u32 %s2706_s18, 4  ;;  %s2032_s7 = int_to_ptr.vmem [resolvable:$true] %s2031_s7 }
 0xa5c   :  { %s2660_s19 = scalar_lea.vmem %s2032_s7, 128  ;;  %p2665_p3 = scmp.lt.s32.totalorder %s2032_s7, %s2032_s7 }
 0xa5d   :  { %p2661_p2 = scmp.ne.s32.totalorder %s2032_s7, %s2660_s19  ;;  %p2666_p4 = scmp.lt.s32.totalorder %s2660_s19, %s2660_s19 }
 0xa5f   :  { %p2667_p5 = por %p2666_p4, %p2665_p3 }
 0xa61   :  { %p2668_p6 = pnand %p2667_p5, %p2661_p2 }
 0xb0c   :  { %v2020_v12 = vpop.f32.mrf.mxu0 }
 0xb0d   :  { %v2021_v26 = vadd.f32 %v2177_v31, %v2020_v12 }
 0xb0e   :  { %v2229_v28 = vpop.f32.mrf.mxu0 }
 0xb0f   :  { %2024 = vst [vmem:[#allocation13] sm:$0xff] %v2021_v26 }
 0xb10   :  { %2671 = shalt.err (!%p2668_p6)
}
 0xb11   :  { %2034 = dma.vmem_to_hbm [thread:$0]  %s2032_s7, 128, %s3473_s6, [#allocation7]  }
 0xb12   :  { %2686 = dma.done.wait [#allocation7], 128  }
 0xb13   :  { %2687 = vsyncadd [#allocation7], 4294967168 }
 0xb14   :  { %2688 = dma.done.wait [#allocation15], 256  }
 0xb15   :  { %2689 = vsyncadd [#allocation15], 4294967040 }
 0xb16   :  { %2064 = vsyncpa [#allocation6], 1 }
 0xb17   :  { %2065 = vsyncpa [#allocation9], 1 }
 0xb18   :  { %2066 = vsyncpa [#allocation12], 1 }
 0xb19   :  { %2067 = vsyncpa [#allocation7], 1 }
 0xb1a   :  { %2068 = vsyncpa [#allocation15], 1 }

</bundles_post_ra>
